<compile_context>
chip_gen: v6e
topology: v6e:2x2x1
jax: 0.10.0
libtpu: 0.0.40
codegen_flags: <defaults>
</compile_context>

<pallas_src>
import functools

import jax
import jax.numpy as jnp
from jax import lax
from jax.experimental import pallas as pl
from jax.experimental.pallas import tpu as pltpu

N_EMBD = 384            # from the module
HIDDEN = 4 * N_EMBD     # 1536
DROPOUT_P = 0.5
_KEEP_SCALE = 1.0 / (1.0 - DROPOUT_P)


def _round_up(x, m):
    return ((x + m - 1) // m) * m


def ffn_kernel(seed_ref, x_ref, w1_ref, b1_ref, w2_ref, b2_ref, o_ref):
    # ---- Linear 1 (bf16 MXU inputs, f32 accumulation) + bias + ReLU ----
    xb = x_ref[...].astype(jnp.bfloat16)
    h = jnp.dot(xb, w1_ref[...], preferred_element_type=jnp.float32)
    h = jnp.maximum(h + b1_ref[...], 0.0)            # (tm, H) + (1, H)

    # ---- Linear 2 (bf16 MXU inputs, f32 accumulation) + bias ----
    y = jnp.dot(h.astype(jnp.bfloat16), w2_ref[...],
                preferred_element_type=jnp.float32)
    y = y + b2_ref[...]                              # (tm, C) + (1, C)

    # ---- Dropout p=0.5, training semantics: keep w.p. 0.5, scale by 2 ----
    # Stateless counter-based hash keyed on (seed, global element index):
    # deterministic, independent per tile (so the grid axis can be "parallel"),
    # and lowers everywhere (no pltpu.prng_* primitives).
    # TODO(synk): dropout RNG stream differs from torch's; same Bernoulli(0.5)
    # mask + 1/(1-p) scaling semantics, deterministic given `seed`.
    tm, cc = y.shape
    row = lax.broadcasted_iota(jnp.int32, (tm, cc), 0).astype(jnp.uint32)
    col = lax.broadcasted_iota(jnp.int32, (tm, cc), 1).astype(jnp.uint32)
    base = (pl.program_id(0) * tm).astype(jnp.uint32)
    ctr = (base + row) * jnp.uint32(cc) + col
    z = ctr ^ (seed_ref[0].astype(jnp.uint32) * jnp.uint32(0x9E3779B9))
    z = (z ^ (z >> 16)) * jnp.uint32(0x7FEB352D)     # murmur3-style fmix32
    z = (z ^ (z >> 15)) * jnp.uint32(0x846CA68B)
    z = z ^ (z >> 16)
    keep = (z >> 31) == jnp.uint32(0)                # top bit clear -> p_keep = 0.5
    y = jnp.where(keep, y * jnp.float32(_KEEP_SCALE), jnp.float32(0.0))

    o_ref[...] = y.astype(o_ref.dtype)


@functools.partial(jax.jit, static_argnames=("tm",))
def feed_forward(x, w1, b1, w2, b2, seed, *, tm=256):
    """x: (B, T, C) float32; w1: (C, H); b1: (H,); w2: (H, C); b2: (C,)."""
    B, T, C = x.shape
    H = w1.shape[1]
    assert C == N_EMBD and H == HIDDEN
    M = B * T

    # Large row tiles to fill the MXU; pad ragged M instead of asserting.
    tm_eff = min(tm, _round_up(M, 8))
    M_pad = _round_up(M, tm_eff)

    x2 = x.reshape(M, C)
    if M_pad != M:
        x2 = jnp.pad(x2, ((0, M_pad - M), (0, 0)))

    # Cast weights to bf16 once (halves weight DMA + VMEM footprint); biases stay f32.
    w1b = w1.astype(jnp.bfloat16)
    w2b = w2.astype(jnp.bfloat16)
    b1_2 = b1.reshape(1, H).astype(jnp.float32)
    b2_2 = b2.reshape(1, C).astype(jnp.float32)
    seed_arr = jnp.asarray(seed, dtype=jnp.int32).reshape(1)

    out = pl.pallas_call(
        ffn_kernel,
        out_shape=jax.ShapeDtypeStruct((M_pad, C), x.dtype),
        grid_spec=pltpu.PrefetchScalarGridSpec(
            num_scalar_prefetch=1,                   # seed lives in SMEM
            grid=(M_pad // tm_eff,),
            in_specs=[
                pl.BlockSpec((tm_eff, C), lambda i, s: (i, 0)),   # x row tile
                pl.BlockSpec((C, H), lambda i, s: (0, 0)),        # W1 (resident)
                pl.BlockSpec((1, H), lambda i, s: (0, 0)),        # b1
                pl.BlockSpec((H, C), lambda i, s: (0, 0)),        # W2 (resident)
                pl.BlockSpec((1, C), lambda i, s: (0, 0)),        # b2
            ],
            out_specs=pl.BlockSpec((tm_eff, C), lambda i, s: (i, 0)),
        ),
        compiler_params=pltpu.CompilerParams(
            dimension_semantics=("parallel",),       # tiles independent -> megacore OK
            vmem_limit_bytes=32 * 1024 * 1024,       # headroom for large tiles (v5e default is 16 MiB)
        ),
    )(seed_arr, x2, w1b, b1_2, w2b, b2_2)

    return out[:M].reshape(B, T, C)


def init_params(key, n_embd=N_EMBD):
    """Deterministic init mirroring nn.Linear default: U(-1/sqrt(fan_in), 1/sqrt(fan_in))."""
    h = 4 * n_embd
    k1, k2, k3, k4 = jax.random.split(key, 4)
    lim1 = 1.0 / jnp.sqrt(jnp.float32(n_embd))
    lim2 = 1.0 / jnp.sqrt(jnp.float32(h))
    w1 = jax.random.uniform(k1, (n_embd, h), jnp.float32, -lim1, lim1)
    b1 = jax.random.uniform(k2, (h,), jnp.float32, -lim1, lim1)
    w2 = jax.random.uniform(k3, (h, n_embd), jnp.float32, -lim2, lim2)
    b2 = jax.random.uniform(k4, (n_embd,), jnp.float32, -lim2, lim2)
    return w1, b1, w2, b2


if __name__ == "__main__":
    key = jax.random.PRNGKey(0)
    k_x, k_p = jax.random.split(key)

    B, T = 2, 8
    x = jax.random.normal(k_x, (B, T, N_EMBD), dtype=jnp.float32)
    w1, b1, w2, b2 = init_params(k_p)

    y = feed_forward(x, w1, b1, w2, b2, seed=0)
    jax.block_until_ready(y)
    assert y.shape == (B, T, N_EMBD) and y.dtype == jnp.float32
    print("KERNEL_OK")
</pallas_src>

<mosaic_0001>
module attributes {stable_mosaic.version = 11 : i64} {
  func.func @ffn_kernel(%arg0: i32, %arg1: memref<1xi32, #tpu.memory_space<smem>>, %arg2: memref<16x384xf32, #tpu.memory_space<vmem>>, %arg3: memref<384x1536xbf16, #tpu.memory_space<vmem>>, %arg4: memref<1x1536xf32, #tpu.memory_space<vmem>>, %arg5: memref<1536x384xbf16, #tpu.memory_space<vmem>>, %arg6: memref<1x384xf32, #tpu.memory_space<vmem>>, %arg7: memref<16x384xf32, #tpu.memory_space<vmem>>) attributes {dimension_semantics = [#tpu.dimension_semantics<parallel>], iteration_bounds = array<i64: 1>, scalar_prefetch = 1 : i64, scratch_operands = 0 : i64, tpu.core_type = #tpu.core_type<tc>, window_params = [{transform_indices = @transform_0, window_bounds = array<i64: 16, 384>}, {pipeline_mode = #tpu.pipeline_mode<synchronous>, transform_indices = @transform_1, window_bounds = array<i64: 384, 1536>}, {pipeline_mode = #tpu.pipeline_mode<synchronous>, transform_indices = @transform_2, window_bounds = array<i64: 1, 1536>}, {pipeline_mode = #tpu.pipeline_mode<synchronous>, transform_indices = @transform_3, window_bounds = array<i64: 1536, 384>}, {pipeline_mode = #tpu.pipeline_mode<synchronous>, transform_indices = @transform_4, window_bounds = array<i64: 1, 384>}, {transform_indices = @transform_5, window_bounds = array<i64: 16, 384>}]} {
    %c0 = arith.constant 0 : index
    %c0_0 = arith.constant 0 : index
    %0 = vector.load %arg2[%c0, %c0_0] : memref<16x384xf32, #tpu.memory_space<vmem>>, vector<16x384xf32>
    %1 = arith.truncf %0 : vector<16x384xf32> to vector<16x384xbf16>
    %c0_1 = arith.constant 0 : index
    %c0_2 = arith.constant 0 : index
    %2 = vector.load %arg3[%c0_1, %c0_2] : memref<384x1536xbf16, #tpu.memory_space<vmem>>, vector<384x1536xbf16>
    %cst = arith.constant dense<0.000000e+00> : vector<16x1536xf32>
    %3 = tpu.matmul %1, %2, %cst {dimension_numbers = #tpu.dot_dimension_numbers<[1], [0], [0], [1], [0, 0, 1, 1], [], []>} : vector<16x384xbf16>, vector<384x1536xbf16>, vector<16x1536xf32> -> vector<16x1536xf32>
    %c0_3 = arith.constant 0 : index
    %c0_4 = arith.constant 0 : index
    %4 = vector.load %arg4[%c0_3, %c0_4] : memref<1x1536xf32, #tpu.memory_space<vmem>>, vector<1x1536xf32>
    %5 = vector.broadcast %4 : vector<1x1536xf32> to vector<16x1536xf32>
    %6 = arith.addf %3, %5 : vector<16x1536xf32>
    %cst_5 = arith.constant 0.000000e+00 : f32
    %7 = vector.broadcast %cst_5 : f32 to vector<16x1536xf32>
    %8 = arith.maximumf %6, %7 : vector<16x1536xf32>
    %9 = arith.truncf %8 : vector<16x1536xf32> to vector<16x1536xbf16>
    %c0_6 = arith.constant 0 : index
    %c0_7 = arith.constant 0 : index
    %10 = vector.load %arg5[%c0_6, %c0_7] : memref<1536x384xbf16, #tpu.memory_space<vmem>>, vector<1536x384xbf16>
    %cst_8 = arith.constant dense<0.000000e+00> : vector<16x384xf32>
    %11 = tpu.matmul %9, %10, %cst_8 {dimension_numbers = #tpu.dot_dimension_numbers<[1], [0], [0], [1], [0, 0, 1, 1], [], []>} : vector<16x1536xbf16>, vector<1536x384xbf16>, vector<16x384xf32> -> vector<16x384xf32>
    %c0_9 = arith.constant 0 : index
    %c0_10 = arith.constant 0 : index
    %12 = vector.load %arg6[%c0_9, %c0_10] : memref<1x384xf32, #tpu.memory_space<vmem>>, vector<1x384xf32>
    %13 = vector.broadcast %12 : vector<1x384xf32> to vector<16x384xf32>
    %14 = arith.addf %11, %13 : vector<16x384xf32>
    %15 = tpu.iota {dimensions = array<i32: 0>} : vector<16x384xi32>
    %16 = tpu.iota {dimensions = array<i32: 1>} : vector<16x384xi32>
    %c16_i32 = arith.constant 16 : i32
    %17 = arith.muli %arg0, %c16_i32 : i32
    %18 = vector.broadcast %17 : i32 to vector<16x384xi32>
    %19 = arith.addi %18, %15 : vector<16x384xi32>
    %c384_i32 = arith.constant 384 : i32
    %20 = vector.broadcast %c384_i32 : i32 to vector<16x384xi32>
    %21 = arith.muli %19, %20 : vector<16x384xi32>
    %22 = arith.addi %21, %16 : vector<16x384xi32>
    %c0_11 = arith.constant 0 : index
    %23 = memref.load %arg1[%c0_11] : memref<1xi32, #tpu.memory_space<smem>>
    %c-1640531527_i32 = arith.constant -1640531527 : i32
    %24 = arith.muli %23, %c-1640531527_i32 : i32
    %25 = vector.broadcast %24 : i32 to vector<16x384xi32>
    %26 = arith.xori %22, %25 : vector<16x384xi32>
    %c16_i32_12 = arith.constant 16 : i32
    %27 = vector.broadcast %c16_i32_12 : i32 to vector<16x384xi32>
    %28 = arith.shrui %26, %27 : vector<16x384xi32>
    %29 = arith.xori %26, %28 : vector<16x384xi32>
    %c2146121005_i32 = arith.constant 2146121005 : i32
    %30 = vector.broadcast %c2146121005_i32 : i32 to vector<16x384xi32>
    %31 = arith.muli %29, %30 : vector<16x384xi32>
    %c15_i32 = arith.constant 15 : i32
    %32 = vector.broadcast %c15_i32 : i32 to vector<16x384xi32>
    %33 = arith.shrui %31, %32 : vector<16x384xi32>
    %34 = arith.xori %31, %33 : vector<16x384xi32>
    %c-2073254261_i32 = arith.constant -2073254261 : i32
    %35 = vector.broadcast %c-2073254261_i32 : i32 to vector<16x384xi32>
    %36 = arith.muli %34, %35 : vector<16x384xi32>
    %c16_i32_13 = arith.constant 16 : i32
    %37 = vector.broadcast %c16_i32_13 : i32 to vector<16x384xi32>
    %38 = arith.shrui %36, %37 : vector<16x384xi32>
    %39 = arith.xori %36, %38 : vector<16x384xi32>
    %c31_i32 = arith.constant 31 : i32
    %40 = vector.broadcast %c31_i32 : i32 to vector<16x384xi32>
    %41 = arith.shrui %39, %40 : vector<16x384xi32>
    %c0_i32 = arith.constant 0 : i32
    %42 = vector.broadcast %c0_i32 : i32 to vector<16x384xi32>
    %43 = arith.cmpi eq, %41, %42 : vector<16x384xi32>
    %cst_14 = arith.constant 2.000000e+00 : f32
    %44 = vector.broadcast %cst_14 : f32 to vector<16x384xf32>
    %45 = arith.mulf %14, %44 : vector<16x384xf32>
    %cst_15 = arith.constant 0.000000e+00 : f32
    %46 = vector.broadcast %cst_15 : f32 to vector<16x384xf32>
    %47 = arith.select %43, %45, %46 : vector<16x384xi1>, vector<16x384xf32>
    %c0_16 = arith.constant 0 : index
    %c0_17 = arith.constant 0 : index
    %48 = vector.load %arg7[%c0_16, %c0_17] : memref<16x384xf32, #tpu.memory_space<vmem>>, vector<16x384xf32>
    tpu.vector_store %arg7[%c0_16, %c0_17], %47 {strides = array<i32>} : memref<16x384xf32, #tpu.memory_space<vmem>>, vector<16x384xf32>,
    return
  }
  func.func @transform_0(%arg0: i32, %arg1: memref<1xi32, #tpu.memory_space<smem>>) -> (i32, i32) {
    %c0_i32 = arith.constant 0 : i32
    %c0_i32_0 = arith.constant 0 : i32
    return %arg0, %c0_i32 : i32, i32
  }
  func.func @transform_1(%arg0: i32, %arg1: memref<1xi32, #tpu.memory_space<smem>>) -> (i32, i32) {
    %c0_i32 = arith.constant 0 : i32
    %c0_i32_0 = arith.constant 0 : i32
    %c0_i32_1 = arith.constant 0 : i32
    return %c0_i32, %c0_i32_0 : i32, i32
  }
  func.func @transform_2(%arg0: i32, %arg1: memref<1xi32, #tpu.memory_space<smem>>) -> (i32, i32) {
    %c0_i32 = arith.constant 0 : i32
    %c0_i32_0 = arith.constant 0 : i32
    %c0_i32_1 = arith.constant 0 : i32
    return %c0_i32, %c0_i32_0 : i32, i32
  }
  func.func @transform_3(%arg0: i32, %arg1: memref<1xi32, #tpu.memory_space<smem>>) -> (i32, i32) {
    %c0_i32 = arith.constant 0 : i32
    %c0_i32_0 = arith.constant 0 : i32
    %c0_i32_1 = arith.constant 0 : i32
    return %c0_i32, %c0_i32_0 : i32, i32
  }
  func.func @transform_4(%arg0: i32, %arg1: memref<1xi32, #tpu.memory_space<smem>>) -> (i32, i32) {
    %c0_i32 = arith.constant 0 : i32
    %c0_i32_0 = arith.constant 0 : i32
    %c0_i32_1 = arith.constant 0 : i32
    return %c0_i32, %c0_i32_0 : i32, i32
  }
  func.func @transform_5(%arg0: i32, %arg1: memref<1xi32, #tpu.memory_space<smem>>) -> (i32, i32) {
    %c0_i32 = arith.constant 0 : i32
    %c0_i32_0 = arith.constant 0 : i32
    return %arg0, %c0_i32 : i32, i32
  }
}

</mosaic_0001>

<bundles_post_ra>
// kernel: feed_forward.1
= control target key start
LH: loop header
LB: loop body
LE: loop exit
PB: predicated region body
PF: predicated region fallthrough
CT: control target
= control target key end

     0   :  { %v6491_v2 = vmov 0   ;;  %s8480_s0 = inlined_call_operand.<no memory space> [shape: s32[1], index: 0, kind: input, shape index: {}]   ;;  %s8481_s1 = inlined_call_operand.vmem [shape: f32[16,384], index: 1, kind: input, shape index: {}]   ;;  %s8482_s2 = inlined_call_operand.vmem [shape: bf16[384,1536], index: 2, kind: input, shape index: {}]   ;;  %s8483_s3 = inlined_call_operand.vmem [shape: f32[1,1536], index: 3, kind: input, shape index: {}]   ;;  %s8484_s4 = inlined_call_operand.vmem [shape: bf16[1536,384], index: 4, kind: input, shape index: {}]   ;;  %s8485_s5 = inlined_call_operand.vmem [shape: f32[1,384], index: 5, kind: input, shape index: {}]   ;;  %s8486_s6 = inlined_call_operand.hbm [shape: f32[16,384], index: 6, kind: output, shape index: {}]  }
   0x1   :  { %v5652_v0 = vld [vmem:[%s8482_s2 + $0x2a4] ss:$48 sps:$4 sm:$0xff]   ;;  %1900 = vmatprep.mubr.bf16.mxu1 %v6491_v2  ;;  %v5656_v3 = vld [vmem:[%s8482_s2 + $0x2a0] ss:$48 sps:$4 sm:$0xff]   ;;  %v29_v34 = vld [vmem:[%s8481_s1 + $0x28] sm:$0xff] }
   0x2   :  { %v5654_v1 = vld [vmem:[%s8482_s2 + $0x8a4] ss:$48 sps:$4 sm:$0xff]   ;;  %1825 = vmatprep.subr.bf16.mxu0 %v5652_v0  ;;  %v5657_v4 = vld [vmem:[%s8482_s2 + $0x8a0] ss:$48 sps:$4 sm:$0xff]   ;;  %v5704_v36 = vld [vmem:[%s8482_s2 + $0x2ac] ss:$48 sps:$4 sm:$0xff]  }
   0x3   :  { %1868 = vmatprep.subr.bf16.mxu1 %v5654_v1  ;;  %v5658_v5 = vld [vmem:[%s8482_s2 + $0x244] ss:$48 sps:$4 sm:$0xff]   ;;  %1826 = vmatpush1.bf16.msra.mxu0 %v5656_v3  ;;  %v5662_v7 = vld [vmem:[%s8482_s2 + $0x240] ss:$48 sps:$4 sm:$0xff]   ;;  %v5702_v38 = vld [vmem:[%s8482_s2 + $0x2a8] ss:$48 sps:$4 sm:$0xff]  }
   0x4   :  { %1869 = vmatpush1.bf16.msra.mxu1 %v5657_v4  ;;  %v5660_v6 = vld [vmem:[%s8482_s2 + $0x844] ss:$48 sps:$4 sm:$0xff]   ;;  %1827 = vmatprep.subr.bf16.mxu0 %v5658_v5  ;;  %v5663_v8 = vld [vmem:[%s8482_s2 + $0x840] ss:$48 sps:$4 sm:$0xff]   ;;  %v5710_v41 = vld [vmem:[%s8482_s2 + $0x24c] ss:$48 sps:$4 sm:$0xff]  }
   0x5   :  { %1870 = vmatprep.subr.bf16.mxu1 %v5660_v6  ;;  %v5664_v9 = vld [vmem:[%s8482_s2 + $0x1e4] ss:$48 sps:$4 sm:$0xff]   ;;  %v5668_v11 = vld [vmem:[%s8482_s2 + $0x1e0] ss:$48 sps:$4 sm:$0xff]   ;;  %v5708_v42 = vld [vmem:[%s8482_s2 + $0x248] ss:$48 sps:$4 sm:$0xff]  }
   0x6   :  { %v5666_v10 = vld [vmem:[%s8482_s2 + $0x7e4] ss:$48 sps:$4 sm:$0xff]   ;;  %v5669_v12 = vld [vmem:[%s8482_s2 + $0x7e0] ss:$48 sps:$4 sm:$0xff]   ;;  %v5716_v45 = vld [vmem:[%s8482_s2 + $0x1ec] ss:$48 sps:$4 sm:$0xff]  }
   0x7   :  { %1828 = vmatpush1.bf16.msra.mxu0 %v5662_v7  ;;  %v5670_v13 = vld [vmem:[%s8482_s2 + $0x184] ss:$48 sps:$4 sm:$0xff]   ;;  %v5674_v15 = vld [vmem:[%s8482_s2 + $0x180] ss:$48 sps:$4 sm:$0xff]   ;;  %v5714_v46 = vld [vmem:[%s8482_s2 + $0x1e8] ss:$48 sps:$4 sm:$0xff]  }
   0x8   :  { %1871 = vmatpush1.bf16.msra.mxu1 %v5663_v8  ;;  %1829 = vmatprep.subr.bf16.mxu0 %v5664_v9  ;;  %v5672_v14 = vld [vmem:[%s8482_s2 + $0x784] ss:$48 sps:$4 sm:$0xff]   ;;  %v5675_v16 = vld [vmem:[%s8482_s2 + $0x780] ss:$48 sps:$4 sm:$0xff]   ;;  %v5722_v49 = vld [vmem:[%s8482_s2 + $0x18c] ss:$48 sps:$4 sm:$0xff]  }
   0x9   :  { %1872 = vmatprep.subr.bf16.mxu1 %v5666_v10  ;;  %v5676_v17 = vld [vmem:[%s8482_s2 + $0x124] ss:$48 sps:$4 sm:$0xff]   ;;  %v5680_v19 = vld [vmem:[%s8482_s2 + $0x120] ss:$48 sps:$4 sm:$0xff]   ;;  %v25_v50 = vld [vmem:[%s8481_s1 + $0x8] sm:$0xff] }
   0xa   :  { %v5678_v18 = vld [vmem:[%s8482_s2 + $0x724] ss:$48 sps:$4 sm:$0xff]   ;;  %v5681_v20 = vld [vmem:[%s8482_s2 + $0x720] ss:$48 sps:$4 sm:$0xff]   ;;  %v5720_v52 = vld [vmem:[%s8482_s2 + $0x188] ss:$48 sps:$4 sm:$0xff]  }
   0xb   :  { %1830 = vmatpush1.bf16.msra.mxu0 %v5668_v11  ;;  %v5682_v21 = vld [vmem:[%s8482_s2 + $0xc4] ss:$48 sps:$4 sm:$0xff]   ;;  %v5686_v23 = vld [vmem:[%s8482_s2 + $0xc0] ss:$48 sps:$4 sm:$0xff]   ;;  %v5728_v56 = vld [vmem:[%s8482_s2 + $0x12c] ss:$48 sps:$4 sm:$0xff]  }
   0xc   :  { %1873 = vmatpush1.bf16.msra.mxu1 %v5669_v12  ;;  %1831 = vmatprep.subr.bf16.mxu0 %v5670_v13  ;;  %v5684_v22 = vld [vmem:[%s8482_s2 + $0x6c4] ss:$48 sps:$4 sm:$0xff]   ;;  %v5687_v24 = vld [vmem:[%s8482_s2 + $0x6c0] ss:$48 sps:$4 sm:$0xff]   ;;  %v5726_v57 = vld [vmem:[%s8482_s2 + $0x128] ss:$48 sps:$4 sm:$0xff]  }
   0xd   :  { %1874 = vmatprep.subr.bf16.mxu1 %v5672_v14  ;;  %v5688_v25 = vld [vmem:[%s8482_s2 + $0x64] ss:$48 sps:$4 sm:$0xff]   ;;  %v5692_v27 = vld [vmem:[%s8482_s2 + $0x60] ss:$48 sps:$4 sm:$0xff]   ;;  %v5734_v60 = vld [vmem:[%s8482_s2 + $0xcc] ss:$48 sps:$4 sm:$0xff]  }
   0xe   :  { %v5690_v26 = vld [vmem:[%s8482_s2 + $0x664] ss:$48 sps:$4 sm:$0xff]   ;;  %v5693_v28 = vld [vmem:[%s8482_s2 + $0x660] ss:$48 sps:$4 sm:$0xff]   ;;  %v5732_v61 = vld [vmem:[%s8482_s2 + $0xc8] ss:$48 sps:$4 sm:$0xff]  }
   0xf   :  { %1832 = vmatpush1.bf16.msra.mxu0 %v5674_v15  ;;  %v5694_v29 = vld [vmem:[%s8482_s2 + $0x4] ss:$48 sps:$4 sm:$0xff]   ;;  %v5698_v31 = vld [vmem:[%s8482_s2] ss:$48 sps:$4 sm:$0xff]   ;;  %v5740_v0 = vld [vmem:[%s8482_s2 + $0x6c] ss:$48 sps:$4 sm:$0xff]  }
  0x10   :  { %1875 = vmatpush1.bf16.msra.mxu1 %v5675_v16  ;;  %1833 = vmatprep.subr.bf16.mxu0 %v5676_v17  ;;  %v5696_v30 = vld [vmem:[%s8482_s2 + $0x604] ss:$48 sps:$4 sm:$0xff]   ;;  %v5699_v32 = vld [vmem:[%s8482_s2 + $0x600] ss:$48 sps:$4 sm:$0xff]   ;;  %v5738_v1 = vld [vmem:[%s8482_s2 + $0x68] ss:$48 sps:$4 sm:$0xff]  }
  0x11   :  { %1876 = vmatprep.subr.bf16.mxu1 %v5678_v18  ;;  %v26_v33 = vld [vmem:[%s8481_s1 + $0x10] sm:$0xff]  ;;  %v28_v51 = vld [vmem:[%s8481_s1 + $0x20] sm:$0xff]  ;;  %v5746_v5 = vld [vmem:[%s8482_s2 + $0xc] ss:$48 sps:$4 sm:$0xff]  }
  0x12   :  { %v5700_v35 = vld [vmem:[%s8482_s2 + $0x5a4] ss:$48 sps:$4 sm:$0xff]   ;;  %v6639_v37 = vpack.c.bf16 %v29_v34, %v26_v33  ;;  %v5705_v39 = vld [vmem:[%s8482_s2 + $0x5a0] ss:$48 sps:$4 sm:$0xff]   ;;  %v6690_v54 = vpack.c.bf16 %v28_v51, %v25_v50  ;;  %v5744_v6 = vld [vmem:[%s8482_s2 + $0x8] ss:$48 sps:$4 sm:$0xff]  }
  0x13   :  { %1834 = vmatpush1.bf16.msra.mxu0 %v5680_v19  ;;  %v5706_v40 = vld [vmem:[%s8482_s2 + $0x544] ss:$48 sps:$4 sm:$0xff]   ;;  %v5711_v43 = vld [vmem:[%s8482_s2 + $0x540] ss:$48 sps:$4 sm:$0xff]   ;;  %v27_v9 = vld [vmem:[%s8481_s1 + $0x18] sm:$0xff] }
  0x14   :  { %1877 = vmatpush1.bf16.msra.mxu1 %v5681_v20  ;;  %1835 = vmatprep.subr.bf16.mxu0 %v5682_v21  ;;  %v5712_v44 = vld [vmem:[%s8482_s2 + $0x4e4] ss:$48 sps:$4 sm:$0xff]   ;;  %v5717_v47 = vld [vmem:[%s8482_s2 + $0x4e0] ss:$48 sps:$4 sm:$0xff]   ;;  %v5750_v10 = vld [vmem:[%s8482_s2 + $0x5ac] ss:$48 sps:$4 sm:$0xff]  }
  0x15   :  { %1878 = vmatprep.subr.bf16.mxu1 %v5684_v22  ;;  %v5718_v48 = vld [vmem:[%s8482_s2 + $0x484] ss:$48 sps:$4 sm:$0xff]   ;;  %v5723_v53 = vld [vmem:[%s8482_s2 + $0x480] ss:$48 sps:$4 sm:$0xff]   ;;  %1857 = vmatprep.mubr.bf16.mxu0 %v6690_v54  ;;  %v5753_v11 = vld [vmem:[%s8482_s2 + $0x8ac] ss:$48 sps:$4 sm:$0xff]  }
  0x16   :  { %v5724_v55 = vld [vmem:[%s8482_s2 + $0x424] ss:$48 sps:$4 sm:$0xff]   ;;  %v5729_v58 = vld [vmem:[%s8482_s2 + $0x420] ss:$48 sps:$4 sm:$0xff]   ;;  %v5748_v13 = vld [vmem:[%s8482_s2 + $0x5a8] ss:$48 sps:$4 sm:$0xff]  }
  0x17   :  { %1836 = vmatpush1.bf16.msra.mxu0 %v5686_v23  ;;  %v5730_v59 = vld [vmem:[%s8482_s2 + $0x3c4] ss:$48 sps:$4 sm:$0xff]   ;;  %v5735_v62 = vld [vmem:[%s8482_s2 + $0x3c0] ss:$48 sps:$4 sm:$0xff]   ;;  %v5751_v14 = vld [vmem:[%s8482_s2 + $0x8a8] ss:$48 sps:$4 sm:$0xff]  }
  0x18   :  { %1879 = vmatpush1.bf16.msra.mxu1 %v5687_v24  ;;  %1837 = vmatprep.subr.bf16.mxu0 %v5688_v25  ;;  %v5736_v63 = vld [vmem:[%s8482_s2 + $0x364] ss:$48 sps:$4 sm:$0xff]   ;;  %v5741_v3 = vld [vmem:[%s8482_s2 + $0x360] ss:$48 sps:$4 sm:$0xff]   ;;  %v5756_v15 = vld [vmem:[%s8482_s2 + $0x54c] ss:$48 sps:$4 sm:$0xff]  }
  0x19   :  { %1880 = vmatprep.subr.bf16.mxu1 %v5690_v26  ;;  %v5742_v4 = vld [vmem:[%s8482_s2 + $0x304] ss:$48 sps:$4 sm:$0xff]   ;;  %v5747_v7 = vld [vmem:[%s8482_s2 + $0x300] ss:$48 sps:$4 sm:$0xff]   ;;  %v5759_v16 = vld [vmem:[%s8482_s2 + $0x84c] ss:$48 sps:$4 sm:$0xff]  }
  0x1a   :  { %v24_v8 = vld [vmem:[%s8481_s1] sm:$0xff]  ;;  %v5754_v17 = vld [vmem:[%s8482_s2 + $0x548] ss:$48 sps:$4 sm:$0xff]   ;;  %v5762_v19 = vld [vmem:[%s8482_s2 + $0x4ec] ss:$48 sps:$4 sm:$0xff]  }
  0x1b   :  { %1838 = vmatpush1.bf16.msra.mxu0 %v5692_v27  ;;  %v6754_v12 = vpack.c.bf16 %v27_v9, %v24_v8  ;;  %v5757_v18 = vld [vmem:[%s8482_s2 + $0x848] ss:$48 sps:$4 sm:$0xff]   ;;  %v5765_v20 = vld [vmem:[%s8482_s2 + $0x7ec] ss:$48 sps:$4 sm:$0xff]   ;;  %v5802_v50 = vld [vmem:[%s8482_s2 + $0x250] ss:$48 sps:$4 sm:$0xff]  }
  0x1c   :  { %1881 = vmatpush1.bf16.msra.mxu1 %v5693_v28  ;;  %1839 = vmatprep.subr.bf16.mxu0 %v5694_v29  ;;  %v5760_v21 = vld [vmem:[%s8482_s2 + $0x4e8] ss:$48 sps:$4 sm:$0xff]   ;;  %v5768_v23 = vld [vmem:[%s8482_s2 + $0x48c] ss:$48 sps:$4 sm:$0xff]   ;;  %v5805_v51 = vld [vmem:[%s8482_s2 + $0x850] ss:$48 sps:$4 sm:$0xff]  }
  0x1d   :  { %1882 = vmatprep.subr.bf16.mxu1 %v5696_v30  ;;  %v5763_v22 = vld [vmem:[%s8482_s2 + $0x7e8] ss:$48 sps:$4 sm:$0xff]   ;;  %v5771_v24 = vld [vmem:[%s8482_s2 + $0x78c] ss:$48 sps:$4 sm:$0xff]   ;;  %v5832_v8 = vld [vmem:[%s8482_s2 + $0x70] ss:$48 sps:$4 sm:$0xff]  }
  0x1e   :  { %v5766_v25 = vld [vmem:[%s8482_s2 + $0x488] ss:$48 sps:$4 sm:$0xff]   ;;  %v5774_v27 = vld [vmem:[%s8482_s2 + $0x42c] ss:$48 sps:$4 sm:$0xff]   ;;  %v5835_v9 = vld [vmem:[%s8482_s2 + $0x670] ss:$48 sps:$4 sm:$0xff]  }
  0x1f   :  { %1840 = vmatpush1.bf16.msra.mxu0 %v5698_v31  ;;  %v5769_v26 = vld [vmem:[%s8482_s2 + $0x788] ss:$48 sps:$4 sm:$0xff]   ;;  %v5777_v28 = vld [vmem:[%s8482_s2 + $0x72c] ss:$48 sps:$4 sm:$0xff]  }
  0x20   :  { %1883 = vmatpush1.bf16.msra.mxu1 %v5699_v32  ;;  %1841 = vmatprep.subr.bf16.mxu0 %v5700_v35  ;;  %v5772_v29 = vld [vmem:[%s8482_s2 + $0x428] ss:$48 sps:$4 sm:$0xff]   ;;  %v5780_v31 = vld [vmem:[%s8482_s2 + $0x3cc] ss:$48 sps:$4 sm:$0xff]  }
  0x21   :  { %1911 = vmatprep.subr.bf16.mxu1 %v5704_v36  ;;  %v5775_v30 = vld [vmem:[%s8482_s2 + $0x728] ss:$48 sps:$4 sm:$0xff]   ;;  %v5783_v32 = vld [vmem:[%s8482_s2 + $0x6cc] ss:$48 sps:$4 sm:$0xff]  }
  0x22   :  { %v5778_v33 = vld [vmem:[%s8482_s2 + $0x3c8] ss:$48 sps:$4 sm:$0xff]   ;;  %v5786_v35 = vld [vmem:[%s8482_s2 + $0x36c] ss:$48 sps:$4 sm:$0xff]  }
  0x23   :  { %1901 = vmatmul.mubr.bf16.vlgmr.msra.gmra.mxu1 %v6639_v37  ;;  %1842 = vmatpush2.bf16.msra.mxu0 %v5705_v39  ;;  %v5781_v34 = vld [vmem:[%s8482_s2 + $0x6c8] ss:$48 sps:$4 sm:$0xff]   ;;  %v5789_v36 = vld [vmem:[%s8482_s2 + $0x66c] ss:$48 sps:$4 sm:$0xff]  }
  0x24   :  { %1912 = vmatpush1.bf16.msra.mxu1 %v5702_v38  ;;  %1843 = vmatprep.subr.bf16.mxu0 %v5706_v40  ;;  %v5784_v38 = vld [vmem:[%s8482_s2 + $0x368] ss:$48 sps:$4 sm:$0xff]   ;;  %v5792_v40 = vld [vmem:[%s8482_s2 + $0x30c] ss:$48 sps:$4 sm:$0xff]  }
  0x25   :  { %1913 = vmatprep.subr.bf16.mxu1 %v5710_v41  ;;  %1943 = vmatprep.mubr.bf16.mxu1 %v6690_v54  ;;  %v5787_v39 = vld [vmem:[%s8482_s2 + $0x668] ss:$48 sps:$4 sm:$0xff]   ;;  %v5795_v41 = vld [vmem:[%s8482_s2 + $0x60c] ss:$48 sps:$4 sm:$0xff]  }
  0x27   :  { %1844 = vmatpush2.bf16.msra.mxu0 %v5711_v43  ;;  %v5793_v43 = vld [vmem:[%s8482_s2 + $0x608] ss:$48 sps:$4 sm:$0xff]  }
  0x28   :  { %1914 = vmatpush1.bf16.msra.mxu1 %v5708_v42  ;;  %1845 = vmatprep.subr.bf16.mxu0 %v5712_v44  ;;  %v5790_v42 = vld [vmem:[%s8482_s2 + $0x308] ss:$48 sps:$4 sm:$0xff]   ;;  %v5798_v44 = vld [vmem:[%s8482_s2 + $0x2b4] ss:$48 sps:$4 sm:$0xff]  }
  0x29   :  { %1915 = vmatprep.subr.bf16.mxu1 %v5716_v45  ;;  %v5801_v45 = vld [vmem:[%s8482_s2 + $0x8b4] ss:$48 sps:$4 sm:$0xff]  }
  0x2b   :  { %1846 = vmatpush2.bf16.msra.mxu0 %v5717_v47  ;;  %v5799_v47 = vld [vmem:[%s8482_s2 + $0x8b0] ss:$48 sps:$4 sm:$0xff]  }
  0x2c   :  { %1916 = vmatpush1.bf16.msra.mxu1 %v5714_v46  ;;  %1847 = vmatprep.subr.bf16.mxu0 %v5718_v48  ;;  %v5796_v46 = vld [vmem:[%s8482_s2 + $0x2b0] ss:$48 sps:$4 sm:$0xff]   ;;  %v5804_v48 = vld [vmem:[%s8482_s2 + $0x254] ss:$48 sps:$4 sm:$0xff]  }
  0x2d   :  { %1917 = vmatprep.subr.bf16.mxu1 %v5722_v49  ;;  %v5807_v49 = vld [vmem:[%s8482_s2 + $0x854] ss:$48 sps:$4 sm:$0xff]  }
  0x2f   :  { %1848 = vmatpush2.bf16.msra.mxu0 %v5723_v53  ;;  %v5813_v53 = vld [vmem:[%s8482_s2 + $0x7f4] ss:$48 sps:$4 sm:$0xff]  }
  0x30   :  { %1918 = vmatpush1.bf16.msra.mxu1 %v5720_v52  ;;  %1849 = vmatprep.subr.bf16.mxu0 %v5724_v55  ;;  %v5810_v52 = vld [vmem:[%s8482_s2 + $0x1f4] ss:$48 sps:$4 sm:$0xff]   ;;  %v5808_v55 = vld [vmem:[%s8482_s2 + $0x1f0] ss:$48 sps:$4 sm:$0xff]  }
  0x31   :  { %1919 = vmatprep.subr.bf16.mxu1 %v5728_v56  ;;  %v5811_v56 = vld [vmem:[%s8482_s2 + $0x7f0] ss:$48 sps:$4 sm:$0xff]  }
  0x33   :  { %1850 = vmatpush2.bf16.msra.mxu0 %v5729_v58  ;;  %v5819_v58 = vld [vmem:[%s8482_s2 + $0x794] ss:$48 sps:$4 sm:$0xff]  }
  0x34   :  { %1920 = vmatpush1.bf16.msra.mxu1 %v5726_v57  ;;  %1851 = vmatprep.subr.bf16.mxu0 %v5730_v59  ;;  %v5816_v57 = vld [vmem:[%s8482_s2 + $0x194] ss:$48 sps:$4 sm:$0xff]   ;;  %v5814_v59 = vld [vmem:[%s8482_s2 + $0x190] ss:$48 sps:$4 sm:$0xff]  }
  0x35   :  { %1921 = vmatprep.subr.bf16.mxu1 %v5734_v60  ;;  %v5817_v60 = vld [vmem:[%s8482_s2 + $0x790] ss:$48 sps:$4 sm:$0xff]  }
  0x37   :  { %1852 = vmatpush2.bf16.msra.mxu0 %v5735_v62  ;;  %v5825_v62 = vld [vmem:[%s8482_s2 + $0x734] ss:$48 sps:$4 sm:$0xff]  }
  0x38   :  { %1922 = vmatpush1.bf16.msra.mxu1 %v5732_v61  ;;  %1853 = vmatprep.subr.bf16.mxu0 %v5736_v63  ;;  %v5822_v61 = vld [vmem:[%s8482_s2 + $0x134] ss:$48 sps:$4 sm:$0xff]   ;;  %v5820_v63 = vld [vmem:[%s8482_s2 + $0x130] ss:$48 sps:$4 sm:$0xff]  }
  0x39   :  { %1923 = vmatprep.subr.bf16.mxu1 %v5740_v0  ;;  %v5823_v0 = vld [vmem:[%s8482_s2 + $0x730] ss:$48 sps:$4 sm:$0xff]  }
  0x3b   :  { %1854 = vmatpush2.bf16.msra.mxu0 %v5741_v3  ;;  %v5831_v3 = vld [vmem:[%s8482_s2 + $0x6d4] ss:$48 sps:$4 sm:$0xff]  }
  0x3c   :  { %1924 = vmatpush1.bf16.msra.mxu1 %v5738_v1  ;;  %1855 = vmatprep.subr.bf16.mxu0 %v5742_v4  ;;  %v5828_v1 = vld [vmem:[%s8482_s2 + $0xd4] ss:$48 sps:$4 sm:$0xff]   ;;  %v5826_v4 = vld [vmem:[%s8482_s2 + $0xd0] ss:$48 sps:$4 sm:$0xff]  }
  0x3d   :  { %1925 = vmatprep.subr.bf16.mxu1 %v5746_v5  ;;  %v5829_v5 = vld [vmem:[%s8482_s2 + $0x6d0] ss:$48 sps:$4 sm:$0xff]  }
  0x3f   :  { %1856 = vmatpush2.bf16.msra.mxu0 %v5747_v7  ;;  %v5837_v7 = vld [vmem:[%s8482_s2 + $0x674] ss:$48 sps:$4 sm:$0xff]  }
  0x40   :  { %1926 = vmatpush1.bf16.msra.mxu1 %v5744_v6  ;;  %1954 = vmatprep.subr.bf16.mxu0 %v5753_v11  ;;  %v5834_v6 = vld [vmem:[%s8482_s2 + $0x74] ss:$48 sps:$4 sm:$0xff]  }
  0x41   :  { %1927 = vmatprep.subr.bf16.mxu1 %v5750_v10  ;;  %v5840_v10 = vld [vmem:[%s8482_s2 + $0x14] ss:$48 sps:$4 sm:$0xff]  }
  0x42   :  { %1858 = vmatmul.mubr.bf16.vlgmr.msra.gmra.mxu0 %v6754_v12  ;;  %v5843_v11 = vld [vmem:[%s8482_s2 + $0x614] ss:$48 sps:$4 sm:$0xff]  }
  0x43   :  { %1955 = vmatpush1.bf16.msra.mxu0 %v5751_v14  ;;  %1986 = vmatprep.mubr.bf16.mxu0 %v6491_v2  ;;  %v5841_v14 = vld [vmem:[%s8482_s2 + $0x610] ss:$48 sps:$4 sm:$0xff]  }
  0x44   :  { %1928 = vmatpush2.bf16.msra.mxu1 %v5748_v13  ;;  %1956 = vmatprep.subr.bf16.mxu0 %v5759_v16  ;;  %v5838_v13 = vld [vmem:[%s8482_s2 + $0x10] ss:$48 sps:$4 sm:$0xff]   ;;  %v5849_v16 = vld [vmem:[%s8482_s2 + $0x2bc] ss:$48 sps:$4 sm:$0xff]  }
  0x45   :  { %1929 = vmatprep.subr.bf16.mxu1 %v5756_v15  ;;  %v5846_v15 = vld [vmem:[%s8482_s2 + $0x5b4] ss:$48 sps:$4 sm:$0xff]  }
  0x47   :  { %1957 = vmatpush1.bf16.msra.mxu0 %v5757_v18  ;;  %v5847_v18 = vld [vmem:[%s8482_s2 + $0x2b8] ss:$48 sps:$4 sm:$0xff]  }
  0x48   :  { %1930 = vmatpush2.bf16.msra.mxu1 %v5754_v17  ;;  %1958 = vmatprep.subr.bf16.mxu0 %v5765_v20  ;;  %v5844_v17 = vld [vmem:[%s8482_s2 + $0x5b0] ss:$48 sps:$4 sm:$0xff]   ;;  %v5855_v20 = vld [vmem:[%s8482_s2 + $0x25c] ss:$48 sps:$4 sm:$0xff]  }
  0x49   :  { %1931 = vmatprep.subr.bf16.mxu1 %v5762_v19  ;;  %v5852_v19 = vld [vmem:[%s8482_s2 + $0x554] ss:$48 sps:$4 sm:$0xff]  }
  0x4b   :  { %1959 = vmatpush1.bf16.msra.mxu0 %v5763_v22  ;;  %v5853_v22 = vld [vmem:[%s8482_s2 + $0x258] ss:$48 sps:$4 sm:$0xff]  }
  0x4c   :  { %1932 = vmatpush2.bf16.msra.mxu1 %v5760_v21  ;;  %1960 = vmatprep.subr.bf16.mxu0 %v5771_v24  ;;  %v5850_v21 = vld [vmem:[%s8482_s2 + $0x550] ss:$48 sps:$4 sm:$0xff]   ;;  %v5861_v24 = vld [vmem:[%s8482_s2 + $0x1fc] ss:$48 sps:$4 sm:$0xff]  }
  0x4d   :  { %1933 = vmatprep.subr.bf16.mxu1 %v5768_v23  ;;  %v5858_v23 = vld [vmem:[%s8482_s2 + $0x4f4] ss:$48 sps:$4 sm:$0xff]  }
  0x4f   :  { %1961 = vmatpush1.bf16.msra.mxu0 %v5769_v26  ;;  %v5859_v26 = vld [vmem:[%s8482_s2 + $0x1f8] ss:$48 sps:$4 sm:$0xff]  }
  0x50   :  { %1934 = vmatpush2.bf16.msra.mxu1 %v5766_v25  ;;  %1962 = vmatprep.subr.bf16.mxu0 %v5777_v28  ;;  %v5856_v25 = vld [vmem:[%s8482_s2 + $0x4f0] ss:$48 sps:$4 sm:$0xff]   ;;  %v5867_v28 = vld [vmem:[%s8482_s2 + $0x19c] ss:$48 sps:$4 sm:$0xff]  }
  0x51   :  { %1935 = vmatprep.subr.bf16.mxu1 %v5774_v27  ;;  %v5864_v27 = vld [vmem:[%s8482_s2 + $0x494] ss:$48 sps:$4 sm:$0xff]  }
  0x53   :  { %1963 = vmatpush1.bf16.msra.mxu0 %v5775_v30  ;;  %v5865_v30 = vld [vmem:[%s8482_s2 + $0x198] ss:$48 sps:$4 sm:$0xff]  }
  0x54   :  { %1936 = vmatpush2.bf16.msra.mxu1 %v5772_v29  ;;  %1964 = vmatprep.subr.bf16.mxu0 %v5783_v32  ;;  %v5862_v29 = vld [vmem:[%s8482_s2 + $0x490] ss:$48 sps:$4 sm:$0xff]   ;;  %v5873_v32 = vld [vmem:[%s8482_s2 + $0x13c] ss:$48 sps:$4 sm:$0xff]  }
  0x55   :  { %1937 = vmatprep.subr.bf16.mxu1 %v5780_v31  ;;  %v5870_v31 = vld [vmem:[%s8482_s2 + $0x434] ss:$48 sps:$4 sm:$0xff]  }
  0x57   :  { %1965 = vmatpush1.bf16.msra.mxu0 %v5781_v34  ;;  %v5871_v34 = vld [vmem:[%s8482_s2 + $0x138] ss:$48 sps:$4 sm:$0xff]  }
  0x58   :  { %1938 = vmatpush2.bf16.msra.mxu1 %v5778_v33  ;;  %1966 = vmatprep.subr.bf16.mxu0 %v5789_v36  ;;  %v5868_v33 = vld [vmem:[%s8482_s2 + $0x430] ss:$48 sps:$4 sm:$0xff]   ;;  %v5879_v36 = vld [vmem:[%s8482_s2 + $0xdc] ss:$48 sps:$4 sm:$0xff]  }
  0x59   :  { %1939 = vmatprep.subr.bf16.mxu1 %v5786_v35  ;;  %v5876_v35 = vld [vmem:[%s8482_s2 + $0x3d4] ss:$48 sps:$4 sm:$0xff]  }
  0x5b   :  { %1967 = vmatpush1.bf16.msra.mxu0 %v5787_v39  ;;  %v5877_v39 = vld [vmem:[%s8482_s2 + $0xd8] ss:$48 sps:$4 sm:$0xff]  }
  0x5c   :  { %1940 = vmatpush2.bf16.msra.mxu1 %v5784_v38  ;;  %1968 = vmatprep.subr.bf16.mxu0 %v5795_v41  ;;  %v5874_v38 = vld [vmem:[%s8482_s2 + $0x3d0] ss:$48 sps:$4 sm:$0xff]   ;;  %v5885_v41 = vld [vmem:[%s8482_s2 + $0x7c] ss:$48 sps:$4 sm:$0xff]  }
  0x5d   :  { %1941 = vmatprep.subr.bf16.mxu1 %v5792_v40  ;;  %v5882_v40 = vld [vmem:[%s8482_s2 + $0x374] ss:$48 sps:$4 sm:$0xff]  }
  0x5f   :  { %1969 = vmatpush1.bf16.msra.mxu0 %v5793_v43  ;;  %v5883_v43 = vld [vmem:[%s8482_s2 + $0x78] ss:$48 sps:$4 sm:$0xff]  }
  0x60   :  { %1942 = vmatpush2.bf16.msra.mxu1 %v5790_v42  ;;  %1997 = vmatprep.subr.bf16.mxu0 %v5798_v44  ;;  %v5880_v42 = vld [vmem:[%s8482_s2 + $0x370] ss:$48 sps:$4 sm:$0xff]   ;;  %v5888_v44 = vld [vmem:[%s8482_s2 + $0x314] ss:$48 sps:$4 sm:$0xff]  }
  0x61   :  { %2040 = vmatprep.subr.bf16.mxu1 %v5801_v45  ;;  %v5891_v45 = vld [vmem:[%s8482_s2 + $0x1c] ss:$48 sps:$4 sm:$0xff]  }
  0x62   :  { %1987 = vmatmul.mubr.bf16.vlgmr.msra.gmra.mxu0 %v6639_v37 }
  0x63   :  { %1944 = vmatmul.mubr.bf16.vlgmr.msra.gmra.mxu1 %v6754_v12  ;;  %1998 = vmatpush1.bf16.msra.mxu0 %v5796_v46  ;;  %v5886_v46 = vld [vmem:[%s8482_s2 + $0x310] ss:$48 sps:$4 sm:$0xff]  }
  0x64   :  { %2041 = vmatpush1.bf16.msra.mxu1 %v5799_v47  ;;  %1999 = vmatprep.subr.bf16.mxu0 %v5804_v48  ;;  %v5889_v47 = vld [vmem:[%s8482_s2 + $0x18] ss:$48 sps:$4 sm:$0xff]   ;;  %v5894_v48 = vld [vmem:[%s8482_s2 + $0x5bc] ss:$48 sps:$4 sm:$0xff]  }
  0x65   :  { %2042 = vmatprep.subr.bf16.mxu1 %v5807_v49  ;;  %2072 = vmatprep.mubr.bf16.mxu1 %v6491_v2  ;;  %v5897_v49 = vld [vmem:[%s8482_s2 + $0x8bc] ss:$48 sps:$4 sm:$0xff]  }
  0x66   :  { %2029 = vmatprep.mubr.bf16.mxu0 %v6690_v54 }
  0x67   :  { %2000 = vmatpush1.bf16.msra.mxu0 %v5802_v50  ;;  %v5892_v50 = vld [vmem:[%s8482_s2 + $0x5b8] ss:$48 sps:$4 sm:$0xff]  }
  0x68   :  { %2043 = vmatpush1.bf16.msra.mxu1 %v5805_v51  ;;  %2001 = vmatprep.subr.bf16.mxu0 %v5810_v52  ;;  %v5895_v51 = vld [vmem:[%s8482_s2 + $0x8b8] ss:$48 sps:$4 sm:$0xff]   ;;  %v5900_v52 = vld [vmem:[%s8482_s2 + $0x55c] ss:$48 sps:$4 sm:$0xff]  }
  0x69   :  { %2044 = vmatprep.subr.bf16.mxu1 %v5813_v53  ;;  %v5903_v53 = vld [vmem:[%s8482_s2 + $0x85c] ss:$48 sps:$4 sm:$0xff]  }
  0x6b   :  { %2002 = vmatpush1.bf16.msra.mxu0 %v5808_v55  ;;  %v5898_v55 = vld [vmem:[%s8482_s2 + $0x558] ss:$48 sps:$4 sm:$0xff]  }
  0x6c   :  { %2045 = vmatpush1.bf16.msra.mxu1 %v5811_v56  ;;  %2003 = vmatprep.subr.bf16.mxu0 %v5816_v57  ;;  %v5901_v56 = vld [vmem:[%s8482_s2 + $0x858] ss:$48 sps:$4 sm:$0xff]   ;;  %v5906_v57 = vld [vmem:[%s8482_s2 + $0x4fc] ss:$48 sps:$4 sm:$0xff]  }
  0x6d   :  { %2046 = vmatprep.subr.bf16.mxu1 %v5819_v58  ;;  %v5909_v58 = vld [vmem:[%s8482_s2 + $0x7fc] ss:$48 sps:$4 sm:$0xff]  }
  0x6f   :  { %2004 = vmatpush1.bf16.msra.mxu0 %v5814_v59  ;;  %v5904_v59 = vld [vmem:[%s8482_s2 + $0x4f8] ss:$48 sps:$4 sm:$0xff]  }
  0x70   :  { %2047 = vmatpush1.bf16.msra.mxu1 %v5817_v60  ;;  %2005 = vmatprep.subr.bf16.mxu0 %v5822_v61  ;;  %v5907_v60 = vld [vmem:[%s8482_s2 + $0x7f8] ss:$48 sps:$4 sm:$0xff]   ;;  %v5912_v61 = vld [vmem:[%s8482_s2 + $0x49c] ss:$48 sps:$4 sm:$0xff]  }
  0x71   :  { %2048 = vmatprep.subr.bf16.mxu1 %v5825_v62  ;;  %v5915_v62 = vld [vmem:[%s8482_s2 + $0x79c] ss:$48 sps:$4 sm:$0xff]  }
  0x73   :  { %2006 = vmatpush1.bf16.msra.mxu0 %v5820_v63  ;;  %v5910_v63 = vld [vmem:[%s8482_s2 + $0x498] ss:$48 sps:$4 sm:$0xff]  }
  0x74   :  { %2049 = vmatpush1.bf16.msra.mxu1 %v5823_v0  ;;  %2007 = vmatprep.subr.bf16.mxu0 %v5828_v1  ;;  %v5913_v0 = vld [vmem:[%s8482_s2 + $0x798] ss:$48 sps:$4 sm:$0xff]   ;;  %v5918_v1 = vld [vmem:[%s8482_s2 + $0x43c] ss:$48 sps:$4 sm:$0xff]  }
  0x75   :  { %2050 = vmatprep.subr.bf16.mxu1 %v5831_v3  ;;  %v5921_v3 = vld [vmem:[%s8482_s2 + $0x73c] ss:$48 sps:$4 sm:$0xff]  }
  0x77   :  { %2008 = vmatpush1.bf16.msra.mxu0 %v5826_v4  ;;  %v5916_v4 = vld [vmem:[%s8482_s2 + $0x438] ss:$48 sps:$4 sm:$0xff]  }
  0x78   :  { %2051 = vmatpush1.bf16.msra.mxu1 %v5829_v5  ;;  %2009 = vmatprep.subr.bf16.mxu0 %v5834_v6  ;;  %v5919_v5 = vld [vmem:[%s8482_s2 + $0x738] ss:$48 sps:$4 sm:$0xff]   ;;  %v5924_v6 = vld [vmem:[%s8482_s2 + $0x3dc] ss:$48 sps:$4 sm:$0xff]  }
  0x79   :  { %2052 = vmatprep.subr.bf16.mxu1 %v5837_v7  ;;  %v5927_v7 = vld [vmem:[%s8482_s2 + $0x6dc] ss:$48 sps:$4 sm:$0xff]  }
  0x7b   :  { %2010 = vmatpush1.bf16.msra.mxu0 %v5832_v8  ;;  %v5922_v8 = vld [vmem:[%s8482_s2 + $0x3d8] ss:$48 sps:$4 sm:$0xff]  }
  0x7c   :  { %2053 = vmatpush1.bf16.msra.mxu1 %v5835_v9  ;;  %2011 = vmatprep.subr.bf16.mxu0 %v5840_v10  ;;  %v5925_v9 = vld [vmem:[%s8482_s2 + $0x6d8] ss:$48 sps:$4 sm:$0xff]   ;;  %v5930_v10 = vld [vmem:[%s8482_s2 + $0x37c] ss:$48 sps:$4 sm:$0xff]  }
  0x7d   :  { %2054 = vmatprep.subr.bf16.mxu1 %v5843_v11  ;;  %v5933_v11 = vld [vmem:[%s8482_s2 + $0x67c] ss:$48 sps:$4 sm:$0xff]  }
  0x7f   :  { %2012 = vmatpush1.bf16.msra.mxu0 %v5838_v13  ;;  %v5928_v13 = vld [vmem:[%s8482_s2 + $0x378] ss:$48 sps:$4 sm:$0xff]  }
  0x80   :  { %2055 = vmatpush1.bf16.msra.mxu1 %v5841_v14  ;;  %2013 = vmatprep.subr.bf16.mxu0 %v5846_v15  ;;  %v5931_v14 = vld [vmem:[%s8482_s2 + $0x678] ss:$48 sps:$4 sm:$0xff]   ;;  %v5936_v15 = vld [vmem:[%s8482_s2 + $0x31c] ss:$48 sps:$4 sm:$0xff]  }
  0x81   :  { %2083 = vmatprep.subr.bf16.mxu1 %v5849_v16  ;;  %v5939_v16 = vld [vmem:[%s8482_s2 + $0x61c] ss:$48 sps:$4 sm:$0xff]  }
  0x83   :  { %2073 = vmatmul.mubr.bf16.vlgmr.msra.gmra.mxu1 %v6639_v37  ;;  %2014 = vmatpush2.bf16.msra.mxu0 %v5844_v17  ;;  %v5934_v17 = vld [vmem:[%s8482_s2 + $0x318] ss:$48 sps:$4 sm:$0xff]  }
  0x84   :  { %2084 = vmatpush1.bf16.msra.mxu1 %v5847_v18  ;;  %2015 = vmatprep.subr.bf16.mxu0 %v5852_v19  ;;  %v5937_v18 = vld [vmem:[%s8482_s2 + $0x618] ss:$48 sps:$4 sm:$0xff]   ;;  %v5942_v19 = vld [vmem:[%s8482_s2 + $0x2c4] ss:$48 sps:$4 sm:$0xff]  }
  0x85   :  { %2085 = vmatprep.subr.bf16.mxu1 %v5855_v20  ;;  %2115 = vmatprep.mubr.bf16.mxu1 %v6690_v54  ;;  %v5945_v20 = vld [vmem:[%s8482_s2 + $0x8c4] ss:$48 sps:$4 sm:$0xff]  }
  0x87   :  { %2016 = vmatpush2.bf16.msra.mxu0 %v5850_v21  ;;  %v5940_v21 = vld [vmem:[%s8482_s2 + $0x2c0] ss:$48 sps:$4 sm:$0xff]  }
  0x88   :  { %2086 = vmatpush1.bf16.msra.mxu1 %v5853_v22  ;;  %2017 = vmatprep.subr.bf16.mxu0 %v5858_v23  ;;  %v5943_v22 = vld [vmem:[%s8482_s2 + $0x8c0] ss:$48 sps:$4 sm:$0xff]   ;;  %v5948_v23 = vld [vmem:[%s8482_s2 + $0x264] ss:$48 sps:$4 sm:$0xff]  }
  0x89   :  { %2087 = vmatprep.subr.bf16.mxu1 %v5861_v24  ;;  %v5951_v24 = vld [vmem:[%s8482_s2 + $0x864] ss:$48 sps:$4 sm:$0xff]  }
  0x8b   :  { %2018 = vmatpush2.bf16.msra.mxu0 %v5856_v25  ;;  %v5946_v25 = vld [vmem:[%s8482_s2 + $0x260] ss:$48 sps:$4 sm:$0xff]  }
  0x8c   :  { %2088 = vmatpush1.bf16.msra.mxu1 %v5859_v26  ;;  %2019 = vmatprep.subr.bf16.mxu0 %v5864_v27  ;;  %v5949_v26 = vld [vmem:[%s8482_s2 + $0x860] ss:$48 sps:$4 sm:$0xff]   ;;  %v5954_v27 = vld [vmem:[%s8482_s2 + $0x204] ss:$48 sps:$4 sm:$0xff]  }
  0x8d   :  { %2089 = vmatprep.subr.bf16.mxu1 %v5867_v28  ;;  %v5957_v28 = vld [vmem:[%s8482_s2 + $0x804] ss:$48 sps:$4 sm:$0xff]  }
  0x8f   :  { %2020 = vmatpush2.bf16.msra.mxu0 %v5862_v29  ;;  %v5952_v29 = vld [vmem:[%s8482_s2 + $0x200] ss:$48 sps:$4 sm:$0xff]  }
  0x90   :  { %2090 = vmatpush1.bf16.msra.mxu1 %v5865_v30  ;;  %2021 = vmatprep.subr.bf16.mxu0 %v5870_v31  ;;  %v5955_v30 = vld [vmem:[%s8482_s2 + $0x800] ss:$48 sps:$4 sm:$0xff]   ;;  %v5960_v31 = vld [vmem:[%s8482_s2 + $0x1a4] ss:$48 sps:$4 sm:$0xff]  }
  0x91   :  { %2091 = vmatprep.subr.bf16.mxu1 %v5873_v32  ;;  %v5963_v32 = vld [vmem:[%s8482_s2 + $0x7a4] ss:$48 sps:$4 sm:$0xff]  }
  0x93   :  { %2022 = vmatpush2.bf16.msra.mxu0 %v5868_v33  ;;  %v5958_v33 = vld [vmem:[%s8482_s2 + $0x1a0] ss:$48 sps:$4 sm:$0xff]  }
  0x94   :  { %2092 = vmatpush1.bf16.msra.mxu1 %v5871_v34  ;;  %2023 = vmatprep.subr.bf16.mxu0 %v5876_v35  ;;  %v5961_v34 = vld [vmem:[%s8482_s2 + $0x7a0] ss:$48 sps:$4 sm:$0xff]   ;;  %v5966_v35 = vld [vmem:[%s8482_s2 + $0x144] ss:$48 sps:$4 sm:$0xff]  }
  0x95   :  { %2093 = vmatprep.subr.bf16.mxu1 %v5879_v36  ;;  %v5969_v36 = vld [vmem:[%s8482_s2 + $0x744] ss:$48 sps:$4 sm:$0xff]  }
  0x97   :  { %2024 = vmatpush2.bf16.msra.mxu0 %v5874_v38  ;;  %v5964_v38 = vld [vmem:[%s8482_s2 + $0x140] ss:$48 sps:$4 sm:$0xff]  }
  0x98   :  { %2094 = vmatpush1.bf16.msra.mxu1 %v5877_v39  ;;  %2025 = vmatprep.subr.bf16.mxu0 %v5882_v40  ;;  %v5967_v39 = vld [vmem:[%s8482_s2 + $0x740] ss:$48 sps:$4 sm:$0xff]   ;;  %v5972_v40 = vld [vmem:[%s8482_s2 + $0xe4] ss:$48 sps:$4 sm:$0xff]  }
  0x99   :  { %2095 = vmatprep.subr.bf16.mxu1 %v5885_v41  ;;  %v5975_v41 = vld [vmem:[%s8482_s2 + $0x6e4] ss:$48 sps:$4 sm:$0xff]  }
  0x9b   :  { %2026 = vmatpush2.bf16.msra.mxu0 %v5880_v42  ;;  %v5970_v42 = vld [vmem:[%s8482_s2 + $0xe0] ss:$48 sps:$4 sm:$0xff]  }
  0x9c   :  { %2096 = vmatpush1.bf16.msra.mxu1 %v5883_v43  ;;  %2027 = vmatprep.subr.bf16.mxu0 %v5888_v44  ;;  %v5973_v43 = vld [vmem:[%s8482_s2 + $0x6e0] ss:$48 sps:$4 sm:$0xff]   ;;  %v5978_v44 = vld [vmem:[%s8482_s2 + $0x84] ss:$48 sps:$4 sm:$0xff]  }
  0x9d   :  { %2097 = vmatprep.subr.bf16.mxu1 %v5891_v45  ;;  %v5981_v45 = vld [vmem:[%s8482_s2 + $0x684] ss:$48 sps:$4 sm:$0xff]  }
  0x9f   :  { %2028 = vmatpush2.bf16.msra.mxu0 %v5886_v46  ;;  %v5976_v46 = vld [vmem:[%s8482_s2 + $0x80] ss:$48 sps:$4 sm:$0xff]  }
  0xa0   :  { %2098 = vmatpush1.bf16.msra.mxu1 %v5889_v47  ;;  %2126 = vmatprep.subr.bf16.mxu0 %v5897_v49  ;;  %v5979_v47 = vld [vmem:[%s8482_s2 + $0x680] ss:$48 sps:$4 sm:$0xff]   ;;  %v5987_v49 = vld [vmem:[%s8482_s2 + $0x624] ss:$48 sps:$4 sm:$0xff]  }
  0xa1   :  { %2099 = vmatprep.subr.bf16.mxu1 %v5894_v48  ;;  %v5984_v48 = vld [vmem:[%s8482_s2 + $0x24] ss:$48 sps:$4 sm:$0xff]  }
  0xa2   :  { %2030 = vmatmul.mubr.bf16.vlgmr.msra.gmra.mxu0 %v6754_v12 }
  0xa3   :  { %2127 = vmatpush1.bf16.msra.mxu0 %v5895_v51  ;;  %2158 = vmatprep.mubr.bf16.mxu0 %v6491_v2  ;;  %v5985_v51 = vld [vmem:[%s8482_s2 + $0x620] ss:$48 sps:$4 sm:$0xff]  }
  0xa4   :  { %2100 = vmatpush2.bf16.msra.mxu1 %v5892_v50  ;;  %2128 = vmatprep.subr.bf16.mxu0 %v5903_v53  ;;  %v5982_v50 = vld [vmem:[%s8482_s2 + $0x20] ss:$48 sps:$4 sm:$0xff]   ;;  %v5993_v53 = vld [vmem:[%s8482_s2 + $0x2cc] ss:$48 sps:$4 sm:$0xff]  }
  0xa5   :  { %2101 = vmatprep.subr.bf16.mxu1 %v5900_v52  ;;  %v5990_v52 = vld [vmem:[%s8482_s2 + $0x5c4] ss:$48 sps:$4 sm:$0xff]  }
  0xa7   :  { %2129 = vmatpush1.bf16.msra.mxu0 %v5901_v56  ;;  %v5991_v56 = vld [vmem:[%s8482_s2 + $0x2c8] ss:$48 sps:$4 sm:$0xff]  }
  0xa8   :  { %2102 = vmatpush2.bf16.msra.mxu1 %v5898_v55  ;;  %2130 = vmatprep.subr.bf16.mxu0 %v5909_v58  ;;  %v5988_v55 = vld [vmem:[%s8482_s2 + $0x5c0] ss:$48 sps:$4 sm:$0xff]   ;;  %v5999_v58 = vld [vmem:[%s8482_s2 + $0x26c] ss:$48 sps:$4 sm:$0xff]  }
  0xa9   :  { %2103 = vmatprep.subr.bf16.mxu1 %v5906_v57  ;;  %v5996_v57 = vld [vmem:[%s8482_s2 + $0x564] ss:$48 sps:$4 sm:$0xff]  }
  0xab   :  { %2131 = vmatpush1.bf16.msra.mxu0 %v5907_v60  ;;  %v5997_v60 = vld [vmem:[%s8482_s2 + $0x268] ss:$48 sps:$4 sm:$0xff]  }
  0xac   :  { %2104 = vmatpush2.bf16.msra.mxu1 %v5904_v59  ;;  %2132 = vmatprep.subr.bf16.mxu0 %v5915_v62  ;;  %v5994_v59 = vld [vmem:[%s8482_s2 + $0x560] ss:$48 sps:$4 sm:$0xff]   ;;  %v6005_v62 = vld [vmem:[%s8482_s2 + $0x20c] ss:$48 sps:$4 sm:$0xff]  }
  0xad   :  { %2105 = vmatprep.subr.bf16.mxu1 %v5912_v61  ;;  %v6002_v61 = vld [vmem:[%s8482_s2 + $0x504] ss:$48 sps:$4 sm:$0xff]  }
  0xaf   :  { %2133 = vmatpush1.bf16.msra.mxu0 %v5913_v0  ;;  %v6003_v0 = vld [vmem:[%s8482_s2 + $0x208] ss:$48 sps:$4 sm:$0xff]  }
  0xb0   :  { %2106 = vmatpush2.bf16.msra.mxu1 %v5910_v63  ;;  %2134 = vmatprep.subr.bf16.mxu0 %v5921_v3  ;;  %v6000_v63 = vld [vmem:[%s8482_s2 + $0x500] ss:$48 sps:$4 sm:$0xff]  }
  0xb1   :  { %2107 = vmatprep.subr.bf16.mxu1 %v5918_v1  ;;  %v6008_v1 = vld [vmem:[%s8482_s2 + $0x4a4] ss:$48 sps:$4 sm:$0xff]   ;;  %v6006_v3 = vld [vmem:[%s8482_s2 + $0x4a0] ss:$48 sps:$4 sm:$0xff]  }
  0xb3   :  { %2135 = vmatpush1.bf16.msra.mxu0 %v5919_v5  ;;  %v6014_v5 = vld [vmem:[%s8482_s2 + $0x444] ss:$48 sps:$4 sm:$0xff]  }
  0xb4   :  { %2108 = vmatpush2.bf16.msra.mxu1 %v5916_v4  ;;  %2136 = vmatprep.subr.bf16.mxu0 %v5927_v7  ;;  %v6009_v4 = vld [vmem:[%s8482_s2 + $0x1a8] ss:$48 sps:$4 sm:$0xff]   ;;  %v6012_v7 = vld [vmem:[%s8482_s2 + $0x440] ss:$48 sps:$4 sm:$0xff]  }
  0xb5   :  { %2109 = vmatprep.subr.bf16.mxu1 %v5924_v6  ;;  %v6017_v6 = vld [vmem:[%s8482_s2 + $0x14c] ss:$48 sps:$4 sm:$0xff]  }
  0xb7   :  { %2137 = vmatpush1.bf16.msra.mxu0 %v5925_v9  ;;  %v6020_v9 = vld [vmem:[%s8482_s2 + $0x3e4] ss:$48 sps:$4 sm:$0xff]  }
  0xb8   :  { %2110 = vmatpush2.bf16.msra.mxu1 %v5922_v8  ;;  %2138 = vmatprep.subr.bf16.mxu0 %v5933_v11  ;;  %v6015_v8 = vld [vmem:[%s8482_s2 + $0x148] ss:$48 sps:$4 sm:$0xff]   ;;  %v6018_v11 = vld [vmem:[%s8482_s2 + $0x3e0] ss:$48 sps:$4 sm:$0xff]  }
  0xb9   :  { %2111 = vmatprep.subr.bf16.mxu1 %v5930_v10  ;;  %v6023_v10 = vld [vmem:[%s8482_s2 + $0xec] ss:$48 sps:$4 sm:$0xff]  }
  0xbb   :  { %2139 = vmatpush1.bf16.msra.mxu0 %v5931_v14  ;;  %v6026_v14 = vld [vmem:[%s8482_s2 + $0x384] ss:$48 sps:$4 sm:$0xff]  }
  0xbc   :  { %2112 = vmatpush2.bf16.msra.mxu1 %v5928_v13  ;;  %2140 = vmatprep.subr.bf16.mxu0 %v5939_v16  ;;  %v6021_v13 = vld [vmem:[%s8482_s2 + $0xe8] ss:$48 sps:$4 sm:$0xff]   ;;  %v6029_v16 = vld [vmem:[%s8482_s2 + $0x8c] ss:$48 sps:$4 sm:$0xff]  }
  0xbd   :  { %2113 = vmatprep.subr.bf16.mxu1 %v5936_v15  ;;  %v325_v15 = vlaneseq }
  0xbf   :  { %2141 = vmatpush1.bf16.msra.mxu0 %v5937_v18  ;;  %v6027_v18 = vld [vmem:[%s8482_s2 + $0x88] ss:$48 sps:$4 sm:$0xff]  }
  0xc0   :  { %2114 = vmatpush2.bf16.msra.mxu1 %v5934_v17  ;;  %2169 = vmatprep.subr.bf16.mxu0 %v5942_v19  ;;  %v6024_v17 = vld [vmem:[%s8482_s2 + $0x380] ss:$48 sps:$4 sm:$0xff]   ;;  %v6032_v19 = vld [vmem:[%s8482_s2 + $0x324] ss:$48 sps:$4 sm:$0xff]  }
  0xc1   :  { %2212 = vmatprep.subr.bf16.mxu1 %v5945_v20  ;;  %v7334_v20 = vshrl.u32 %v325_v15, 7 }
  0xc2   :  { %2159 = vmatmul.mubr.bf16.vlgmr.msra.gmra.mxu0 %v6639_v37 }
  0xc3   :  { %2116 = vmatmul.mubr.bf16.vlgmr.msra.gmra.mxu1 %v6754_v12  ;;  %2170 = vmatpush1.bf16.msra.mxu0 %v5940_v21  ;;  %v6035_v21 = vld [vmem:[%s8482_s2 + $0x2c] ss:$48 sps:$4 sm:$0xff]  }
  0xc4   :  { %2213 = vmatpush1.bf16.msra.mxu1 %v5943_v22  ;;  %2171 = vmatprep.subr.bf16.mxu0 %v5948_v23  ;;  %v6030_v22 = vld [vmem:[%s8482_s2 + $0x320] ss:$48 sps:$4 sm:$0xff]   ;;  %v6033_v23 = vld [vmem:[%s8482_s2 + $0x28] ss:$48 sps:$4 sm:$0xff]  }
  0xc5   :  { %2214 = vmatprep.subr.bf16.mxu1 %v5951_v24  ;;  %2244 = vmatprep.mubr.bf16.mxu1 %v6491_v2  ;;  %v7348_v24 = vld [vmem:[%s8483_s3] sm:$0xff] }
  0xc6   :  { %2201 = vmatprep.mubr.bf16.mxu0 %v6690_v54 }
  0xc7   :  { %2172 = vmatpush1.bf16.msra.mxu0 %v5946_v25  ;;  %v7351_v25 = vsub.s32 0, %v7334_v20 }
  0xc8   :  { %2215 = vmatpush1.bf16.msra.mxu1 %v5949_v26  ;;  %2173 = vmatprep.subr.bf16.mxu0 %v5954_v27  ;;  %v6038_v26 = vld [vmem:[%s8482_s2 + $0x5cc] ss:$48 sps:$4 sm:$0xff]  }
  0xc9   :  { %2216 = vmatprep.subr.bf16.mxu1 %v5957_v28  ;;  %v6041_v27 = vld [vmem:[%s8482_s2 + $0x8cc] ss:$48 sps:$4 sm:$0xff]   ;;  %v6036_v28 = vld [vmem:[%s8482_s2 + $0x5c8] ss:$48 sps:$4 sm:$0xff]  }
  0xcb   :  { %2174 = vmatpush1.bf16.msra.mxu0 %v5952_v29  ;;  %v328_v29 = vrot.slane %v7348_v24, %v7351_v25 }
  0xcc   :  { %2217 = vmatpush1.bf16.msra.mxu1 %v5955_v30  ;;  %2175 = vmatprep.subr.bf16.mxu0 %v5960_v31  ;;  %v6039_v30 = vld [vmem:[%s8482_s2 + $0x8c8] ss:$48 sps:$4 sm:$0xff]   ;;  %v6044_v31 = vld [vmem:[%s8482_s2 + $0x56c] ss:$48 sps:$4 sm:$0xff]  }
  0xcd   :  { %2218 = vmatprep.subr.bf16.mxu1 %v5963_v32 }
  0xcf   :  { %2176 = vmatpush1.bf16.msra.mxu0 %v5958_v33  ;;  %v6047_v33 = vld [vmem:[%s8482_s2 + $0x86c] ss:$48 sps:$4 sm:$0xff]  }
  0xd0   :  { %2219 = vmatpush1.bf16.msra.mxu1 %v5961_v34  ;;  %2177 = vmatprep.subr.bf16.mxu0 %v5966_v35  ;;  %v6042_v35 = vld [vmem:[%s8482_s2 + $0x568] ss:$48 sps:$4 sm:$0xff]  }
  0xd1   :  { %2220 = vmatprep.subr.bf16.mxu1 %v5969_v36  ;;  %v6045_v36 = vld [vmem:[%s8482_s2 + $0x868] ss:$48 sps:$4 sm:$0xff]  }
  0xd3   :  { %2178 = vmatpush1.bf16.msra.mxu0 %v5964_v38 }
  0xd4   :  { %2221 = vmatpush1.bf16.msra.mxu1 %v5967_v39  ;;  %2179 = vmatprep.subr.bf16.mxu0 %v5972_v40  ;;  %v6050_v39 = vld [vmem:[%s8482_s2 + $0x50c] ss:$48 sps:$4 sm:$0xff]  }
  0xd5   :  { %2222 = vmatprep.subr.bf16.mxu1 %v5975_v41  ;;  %v6053_v40 = vld [vmem:[%s8482_s2 + $0x80c] ss:$48 sps:$4 sm:$0xff]  }
  0xd7   :  { %2180 = vmatpush1.bf16.msra.mxu0 %v5970_v42 }
  0xd8   :  { %2223 = vmatpush1.bf16.msra.mxu1 %v5973_v43  ;;  %2181 = vmatprep.subr.bf16.mxu0 %v5978_v44  ;;  %v6048_v44 = vld [vmem:[%s8482_s2 + $0x508] ss:$48 sps:$4 sm:$0xff]  }
  0xd9   :  { %2224 = vmatprep.subr.bf16.mxu1 %v5981_v45  ;;  %v6051_v45 = vld [vmem:[%s8482_s2 + $0x808] ss:$48 sps:$4 sm:$0xff]  }
  0xdb   :  { %2182 = vmatpush1.bf16.msra.mxu0 %v5976_v46 }
  0xdc   :  { %2225 = vmatpush1.bf16.msra.mxu1 %v5979_v47  ;;  %2183 = vmatprep.subr.bf16.mxu0 %v5984_v48  ;;  %v6056_v47 = vld [vmem:[%s8482_s2 + $0x4ac] ss:$48 sps:$4 sm:$0xff]  }
  0xdd   :  { %2226 = vmatprep.subr.bf16.mxu1 %v5987_v49  ;;  %v6059_v48 = vld [vmem:[%s8482_s2 + $0x7ac] ss:$48 sps:$4 sm:$0xff]  }
  0xdf   :  { %2184 = vmatpush1.bf16.msra.mxu0 %v5982_v50 }
  0xe0   :  { %2227 = vmatpush1.bf16.msra.mxu1 %v5985_v51  ;;  %2185 = vmatprep.subr.bf16.mxu0 %v5990_v52  ;;  %v6057_v52 = vld [vmem:[%s8482_s2 + $0x7a8] ss:$48 sps:$4 sm:$0xff]  }
  0xe1   :  { %2255 = vmatprep.subr.bf16.mxu1 %v5993_v53  ;;  %v6062_v53 = vld [vmem:[%s8482_s2 + $0x44c] ss:$48 sps:$4 sm:$0xff]  }
  0xe3   :  { %2245 = vmatmul.mubr.bf16.vlgmr.msra.gmra.mxu1 %v6639_v37  ;;  %2186 = vmatpush2.bf16.msra.mxu0 %v5988_v55  ;;  %v1902_v32 = vpop.f32.mrf.mxu1  ;;  %v6065_v55 = vld [vmem:[%s8482_s2 + $0x74c] ss:$48 sps:$4 sm:$0xff]  }
  0xe4   :  { %2256 = vmatpush1.bf16.msra.mxu1 %v5991_v56  ;;  %2187 = vmatprep.subr.bf16.mxu0 %v5996_v57 }
  0xe5   :  { %2257 = vmatprep.subr.bf16.mxu1 %v5999_v58  ;;  %2287 = vmatprep.mubr.bf16.mxu1 %v6690_v54  ;;  %v6011_v54 = vld [vmem:[%s8482_s2 + $0x1ac] ss:$48 sps:$4 sm:$0xff]   ;;  %v1904_v41 = vpop.f32.mrf.mxu1 }
  0xe7   :  { %2188 = vmatpush2.bf16.msra.mxu0 %v5994_v59  ;;  %v1906_v50 = vpop.f32.mrf.mxu1  ;;  %v6060_v59 = vld [vmem:[%s8482_s2 + $0x448] ss:$48 sps:$4 sm:$0xff]  }
  0xe8   :  { %2258 = vmatpush1.bf16.msra.mxu1 %v5997_v60  ;;  %2189 = vmatprep.subr.bf16.mxu0 %v6002_v61  ;;  %v6063_v60 = vld [vmem:[%s8482_s2 + $0x748] ss:$48 sps:$4 sm:$0xff]   ;;  %v6068_v61 = vld [vmem:[%s8482_s2 + $0x3ec] ss:$48 sps:$4 sm:$0xff]  }
  0xe9   :  { %2259 = vmatprep.subr.bf16.mxu1 %v6005_v62  ;;  %v6071_v62 = vld [vmem:[%s8482_s2 + $0x6ec] ss:$48 sps:$4 sm:$0xff]  }
  0xeb   :  { %2190 = vmatpush2.bf16.msra.mxu0 %v6000_v63  ;;  %v7426_v63 = vsub.s32 1, %v7334_v20 }
  0xec   :  { %2260 = vmatpush1.bf16.msra.mxu1 %v6003_v0  ;;  %2191 = vmatprep.subr.bf16.mxu0 %v6008_v1  ;;  %v6066_v0 = vld [vmem:[%s8482_s2 + $0x3e8] ss:$48 sps:$4 sm:$0xff]  }
  0xed   :  { %2261 = vmatprep.subr.bf16.mxu1 %v6011_v54  ;;  %v6069_v54 = vld [vmem:[%s8482_s2 + $0x6e8] ss:$48 sps:$4 sm:$0xff]  }
  0xef   :  { %2192 = vmatpush2.bf16.msra.mxu0 %v6006_v3  ;;  %v332_v3 = vrot.slane %v7348_v24, %v7426_v63 }
  0xf0   :  { %2262 = vmatpush1.bf16.msra.mxu1 %v6009_v4  ;;  %2193 = vmatprep.subr.bf16.mxu0 %v6014_v5  ;;  %v6074_v4 = vld [vmem:[%s8482_s2 + $0x38c] ss:$48 sps:$4 sm:$0xff]  }
  0xf1   :  { %2263 = vmatprep.subr.bf16.mxu1 %v6017_v6  ;;  %v6077_v5 = vld [vmem:[%s8482_s2 + $0x68c] ss:$48 sps:$4 sm:$0xff]  }
  0xf3   :  { %2194 = vmatpush2.bf16.msra.mxu0 %v6012_v7  ;;  %v6072_v7 = vld [vmem:[%s8482_s2 + $0x388] ss:$48 sps:$4 sm:$0xff]  }
  0xf4   :  { %2264 = vmatpush1.bf16.msra.mxu1 %v6015_v8  ;;  %2195 = vmatprep.subr.bf16.mxu0 %v6020_v9  ;;  %v6075_v8 = vld [vmem:[%s8482_s2 + $0x688] ss:$48 sps:$4 sm:$0xff]  }
  0xf5   :  { %2265 = vmatprep.subr.bf16.mxu1 %v6023_v10  ;;  %v1908_v10 = vpop.f32.mrf.mxu1 }
  0xf7   :  { %2196 = vmatpush2.bf16.msra.mxu0 %v6018_v11  ;;  %v6080_v11 = vld [vmem:[%s8482_s2 + $0x32c] ss:$48 sps:$4 sm:$0xff]  }
  0xf8   :  { %2266 = vmatpush1.bf16.msra.mxu1 %v6021_v13  ;;  %2197 = vmatprep.subr.bf16.mxu0 %v6026_v14  ;;  %v6083_v13 = vld [vmem:[%s8482_s2 + $0x62c] ss:$48 sps:$4 sm:$0xff]  }
  0xf9   :  { %2267 = vmatprep.subr.bf16.mxu1 %v6029_v16  ;;  %v6078_v16 = vld [vmem:[%s8482_s2 + $0x328] ss:$48 sps:$4 sm:$0xff]  }
  0xfb   :  { %2198 = vmatpush2.bf16.msra.mxu0 %v6024_v17  ;;  %v6081_v17 = vld [vmem:[%s8482_s2 + $0x628] ss:$48 sps:$4 sm:$0xff]  }
  0xfc   :  { %2268 = vmatpush1.bf16.msra.mxu1 %v6027_v18  ;;  %2199 = vmatprep.subr.bf16.mxu0 %v6032_v19  ;;  %v6086_v19 = vld [vmem:[%s8484_s4 + $0xac] ss:$12 sps:$4 sm:$0xff]  }
  0xfd   :  { %2269 = vmatprep.subr.bf16.mxu1 %v6035_v21  ;;  %v6089_v21 = vld [vmem:[%s8484_s4 + $0x22c] ss:$12 sps:$4 sm:$0xff]  }
  0xff   :  { %2200 = vmatpush2.bf16.msra.mxu0 %v6030_v22 }
 0x100   :  { %2270 = vmatpush1.bf16.msra.mxu1 %v6033_v23  ;;  %2298 = vmatprep.subr.bf16.mxu0 %v6041_v27  ;;  %v6084_v23 = vld [vmem:[%s8484_s4 + $0xa8] ss:$12 sps:$4 sm:$0xff]  }
 0x101   :  { %2271 = vmatprep.subr.bf16.mxu1 %v6038_v26  ;;  %v339_v26 = vsub.s32 3, %v7334_v20  ;;  %v6087_v27 = vld [vmem:[%s8484_s4 + $0x228] ss:$12 sps:$4 sm:$0xff]  }
 0x102   :  { %v1859_v34 = vpop.f32.mrf.mxu0  ;;  %2202 = vmatmul.mubr.bf16.vlgmr.msra.gmra.mxu0 %v6754_v12 }
 0x103   :  { %v1860_v38 = vadd.f32 %v1859_v34, %v328_v29  ;;  %2299 = vmatpush1.bf16.msra.mxu0 %v6039_v30  ;;  %2330 = vmatprep.mubr.bf16.mxu0 %v6491_v2  ;;  %v6054_v2 = vld [vmem:[%s8482_s2 + $0x4a8] ss:$48 sps:$4 sm:$0xff]  }
 0x104   :  { %2272 = vmatpush2.bf16.msra.mxu1 %v6036_v28  ;;  %v1861_v42 = vpop.f32.mrf.mxu0  ;;  %2300 = vmatprep.subr.bf16.mxu0 %v6047_v33  ;;  %v6092_v28 = vld [vmem:[%s8484_s4 + $0x94] ss:$12 sps:$4 sm:$0xff]  }
 0x105   :  { %2273 = vmatprep.subr.bf16.mxu1 %v6044_v31  ;;  %v1903_v43 = vadd.f32 %v1902_v32, %v1860_v38  ;;  %v1862_v9 = vadd.f32 %v1861_v42, %v332_v3  ;;  %v340_v31 = vrot.slane %v7348_v24, %v339_v26  ;;  %v6090_v32 = vld [vmem:[%s8484_s4 + $0x90] ss:$12 sps:$4 sm:$0xff]   ;;  %v6095_v33 = vld [vmem:[%s8484_s4 + $0x214] ss:$12 sps:$4 sm:$0xff]  }
 0x106   :  { %v1863_v46 = vpop.f32.mrf.mxu0  ;;  %v6098_v38 = vld [vmem:[%s8484_s4 + $0x7c] ss:$12 sps:$4 sm:$0xff]  }
 0x107   :  { %v1864_v49 = vadd.f32 %v1863_v46, %v328_v29  ;;  %2301 = vmatpush1.bf16.msra.mxu0 %v6045_v36  ;;  %v2341_v56 = vmax.f32 %v1903_v43, 0.0  ;;  %v1905_v18 = vadd.f32 %v1904_v41, %v1862_v9  ;;  %v6093_v36 = vld [vmem:[%s8484_s4 + $0x210] ss:$12 sps:$4 sm:$0xff]   ;;  %v6126_v9 = vld [vmem:[%s8484_s4] ss:$12 sps:$4 sm:$0xff]  }
 0x108   :  { %2274 = vmatpush2.bf16.msra.mxu1 %v6042_v35  ;;  %2302 = vmatprep.subr.bf16.mxu0 %v6053_v40  ;;  %v1865_v1 = vpop.f32.mrf.mxu0 }
 0x109   :  { %2275 = vmatprep.subr.bf16.mxu1 %v6050_v39  ;;  %v1907_v51 = vadd.f32 %v1906_v50, %v1864_v49  ;;  %v1866_v6 = vadd.f32 %v1865_v1, %v332_v3  ;;  %v2342_v29 = vmax.f32 %v1905_v18, 0.0  ;;  %v6102_v50 = vld [vmem:[%s8484_s4 + $0x60] ss:$12 sps:$4 sm:$0xff]   ;;  %v6114_v1 = vld [vmem:[%s8484_s4 + $0x30] ss:$12 sps:$4 sm:$0xff]  }
 0x10a   :  { %v6122_v3 = vld [vmem:[%s8484_s4 + $0x1c] ss:$12 sps:$4 sm:$0xff]  }
 0x10b   :  { %v2353_v57 = vmax.f32 %v1907_v51, 0.0  ;;  %2303 = vmatpush1.bf16.msra.mxu0 %v6051_v45  ;;  %v1909_v14 = vadd.f32 %v1908_v10, %v1866_v6  ;;  %v6123_v6 = vld [vmem:[%s8484_s4 + $0x198] ss:$12 sps:$4 sm:$0xff]   ;;  %v6129_v10 = vld [vmem:[%s8484_s4 + $0x180] ss:$12 sps:$4 sm:$0xff]  }
 0x10c   :  { %2276 = vmatpush2.bf16.msra.mxu1 %v6048_v44  ;;  %2304 = vmatprep.subr.bf16.mxu0 %v6059_v48  ;;  %v6099_v44 = vld [vmem:[%s8484_s4 + $0x1f8] ss:$12 sps:$4 sm:$0xff]   ;;  %v6138_v18 = vld [vmem:[%s8484_s4 + $0x150] ss:$12 sps:$4 sm:$0xff]  }
 0x10d   :  { %2277 = vmatprep.subr.bf16.mxu1 %v6056_v47  ;;  %v7411_v58 = vpack.c.bf16 %v2353_v57, %v2341_v56  ;;  %v2354_v22 = vmax.f32 %v1909_v14, 0.0  ;;  %v6104_v47 = vld [vmem:[%s8484_s4 + $0x64] ss:$12 sps:$4 sm:$0xff]   ;;  %v6132_v14 = vld [vmem:[%s8484_s4 + $0x168] ss:$12 sps:$4 sm:$0xff]  }
 0x10e   :  { %v6107_v48 = vld [vmem:[%s8484_s4 + $0x1e4] ss:$12 sps:$4 sm:$0xff]  }
 0x10f   :  { %2305 = vmatpush1.bf16.msra.mxu0 %v6057_v52  ;;  %v7476_v30 = vpack.c.bf16 %v2354_v22, %v2342_v29  ;;  %v6146_v22 = vld [vmem:[%s8484_s4 + $0x13c] ss:$12 sps:$4 sm:$0xff]   ;;  %v6152_v29 = vld [vmem:[%s8484_s4 + $0x124] ss:$12 sps:$4 sm:$0xff]  }
 0x110   :  { %2278 = vmatpush2.bf16.msra.mxu1 %v6054_v2  ;;  %2306 = vmatprep.subr.bf16.mxu0 %v6065_v55  ;;  %v6105_v2 = vld [vmem:[%s8484_s4 + $0x1e0] ss:$12 sps:$4 sm:$0xff]  }
 0x111   :  { %2279 = vmatprep.subr.bf16.mxu1 %v6062_v53  ;;  %v6110_v53 = vld [vmem:[%s8484_s4 + $0x4c] ss:$12 sps:$4 sm:$0xff]  }
 0x112   :  { %v6113_v55 = vld [vmem:[%s8484_s4 + $0x1cc] ss:$12 sps:$4 sm:$0xff]  }
 0x113   :  { %2307 = vmatpush1.bf16.msra.mxu0 %v6063_v60  ;;  %v6108_v60 = vld [vmem:[%s8484_s4 + $0x48] ss:$12 sps:$4 sm:$0xff]  }
 0x114   :  { %2280 = vmatpush2.bf16.msra.mxu1 %v6060_v59  ;;  %2308 = vmatprep.subr.bf16.mxu0 %v6071_v62  ;;  %v6116_v62 = vld [vmem:[%s8484_s4 + $0x34] ss:$12 sps:$4 sm:$0xff]  }
 0x115   :  { %2281 = vmatprep.subr.bf16.mxu1 %v6068_v61  ;;  %v6111_v61 = vld [vmem:[%s8484_s4 + $0x1c8] ss:$12 sps:$4 sm:$0xff]  }
 0x117   :  { %2309 = vmatpush1.bf16.msra.mxu0 %v6069_v54  ;;  %v6117_v54 = vld [vmem:[%s8484_s4 + $0x1b0] ss:$12 sps:$4 sm:$0xff]  }
 0x118   :  { %2282 = vmatpush2.bf16.msra.mxu1 %v6066_v0  ;;  %2310 = vmatprep.subr.bf16.mxu0 %v6077_v5  ;;  %v6119_v0 = vld [vmem:[%s8484_s4 + $0x1b4] ss:$12 sps:$4 sm:$0xff]   ;;  %v6120_v5 = vld [vmem:[%s8484_s4 + $0x18] ss:$12 sps:$4 sm:$0xff]  }
 0x119   :  { %2283 = vmatprep.subr.bf16.mxu1 %v6074_v4  ;;  %v6125_v4 = vld [vmem:[%s8484_s4 + $0x19c] ss:$12 sps:$4 sm:$0xff]  }
 0x11b   :  { %2311 = vmatpush1.bf16.msra.mxu0 %v6075_v8  ;;  %v6131_v8 = vld [vmem:[%s8484_s4 + $0x184] ss:$12 sps:$4 sm:$0xff]  }
 0x11c   :  { %2284 = vmatpush2.bf16.msra.mxu1 %v6072_v7  ;;  %2312 = vmatprep.subr.bf16.mxu0 %v6083_v13  ;;  %v6128_v7 = vld [vmem:[%s8484_s4 + $0x4] ss:$12 sps:$4 sm:$0xff]   ;;  %v6137_v13 = vld [vmem:[%s8484_s4 + $0x2ec] ss:$12 sps:$4 sm:$0xff]  }
 0x11d   :  { %2285 = vmatprep.subr.bf16.mxu1 %v6080_v11  ;;  %v6134_v11 = vld [vmem:[%s8484_s4 + $0x16c] ss:$12 sps:$4 sm:$0xff]  }
 0x11f   :  { %2313 = vmatpush1.bf16.msra.mxu0 %v6081_v17  ;;  %v6140_v17 = vld [vmem:[%s8484_s4 + $0x154] ss:$12 sps:$4 sm:$0xff]  }
 0x120   :  { %2286 = vmatpush2.bf16.msra.mxu1 %v6078_v16  ;;  %4314 = vmatprep.subr.bf16.mxu0 %v6086_v19  ;;  %v6135_v16 = vld [vmem:[%s8484_s4 + $0x2e8] ss:$12 sps:$4 sm:$0xff]  }
 0x121   :  { %4357 = vmatprep.subr.bf16.mxu1 %v6089_v21  ;;  %v6143_v19 = vld [vmem:[%s8484_s4 + $0x2d4] ss:$12 sps:$4 sm:$0xff]   ;;  %v6141_v21 = vld [vmem:[%s8484_s4 + $0x2d0] ss:$12 sps:$4 sm:$0xff]  }
 0x122   :  { %v7489_v35 = vpop.f32.mrf.mxu0  ;;  %2331 = vmatmul.mubr.bf16.vlgmr.msra.gmra.mxu0 %v6639_v37  ;;  %v6096_v37 = vld [vmem:[%s8484_s4 + $0x78] ss:$12 sps:$4 sm:$0xff]  }
 0x123   :  { %v7487_v34 = vpop.f32.mrf.mxu1  ;;  %2288 = vmatmul.mubr.bf16.vlgmr.msra.gmra.mxu1 %v6754_v12  ;;  %4315 = vmatpush1.bf16.msra.mxu0 %v6084_v23  ;;  %v6101_v12 = vld [vmem:[%s8484_s4 + $0x1fc] ss:$12 sps:$4 sm:$0xff]   ;;  %v6144_v23 = vld [vmem:[%s8484_s4 + $0x138] ss:$12 sps:$4 sm:$0xff]  }
 0x124   :  { %4346 = vmatprep.mubr.bf16.mxu0 %v7476_v30  ;;  %4358 = vmatpush1.bf16.msra.mxu1 %v6087_v27  ;;  %v1990_v40 = vpop.f32.mrf.mxu0  ;;  %v6149_v27 = vld [vmem:[%s8484_s4 + $0x2bc] ss:$12 sps:$4 sm:$0xff]  }
 0x125   :  { %v1947_v39 = vpop.f32.mrf.mxu1  ;;  %4316 = vmatprep.subr.bf16.mxu0 %v6092_v28  ;;  %4359 = vmatprep.subr.bf16.mxu1 %v6095_v33  ;;  %v6147_v28 = vld [vmem:[%s8484_s4 + $0x2b8] ss:$12 sps:$4 sm:$0xff]   ;;  %v6153_v33 = vld [vmem:[%s8484_s4 + $0x2a0] ss:$12 sps:$4 sm:$0xff]  }
 0x126   :  { %v1948_v41 = vadd.f32 %v1947_v39, %v340_v31  ;;  %v7508_v43 = vpop.f32.mrf.mxu0  ;;  %v6156_v39 = vld [vmem:[%s8484_s4 + $0x108] ss:$12 sps:$4 sm:$0xff]  }
 0x127   :  { %v7506_v42 = vpop.f32.mrf.mxu1  ;;  %4317 = vmatpush1.bf16.msra.mxu0 %v6090_v32  ;;  %v6155_v32 = vld [vmem:[%s8484_s4 + $0x2a4] ss:$12 sps:$4 sm:$0xff]  }
 0x128   :  { %v1991_v45 = vadd.f32 %v1990_v40, %v1948_v41  ;;  %4360 = vmatpush1.bf16.msra.mxu1 %v6093_v36  ;;  %4318 = vmatprep.subr.bf16.mxu0 %v6098_v38  ;;  %v1994_v51 = vpop.f32.mrf.mxu0  ;;  %v6158_v36 = vld [vmem:[%s8484_s4 + $0x10c] ss:$12 sps:$4 sm:$0xff]   ;;  %v7628_v38 = vsub.s32 2, %v7334_v20  ;;  %v6159_v41 = vld [vmem:[%s8484_s4 + $0x288] ss:$12 sps:$4 sm:$0xff]  }
 0x129   :  { %v1951_v46 = vpop.f32.mrf.mxu1  ;;  %4361 = vmatprep.subr.bf16.mxu1 %v6101_v12  ;;  %v6161_v40 = vld [vmem:[%s8484_s4 + $0x28c] ss:$12 sps:$4 sm:$0xff]   ;;  %v6167_v12 = vld [vmem:[%s8484_s4 + $0x274] ss:$12 sps:$4 sm:$0xff]  }
 0x12a   :  { %v1952_v49 = vadd.f32 %v1951_v46, %v340_v31  ;;  %v2344_v56 = vmax.f32 %v1991_v45, 0.0  ;;  %v6150_v31 = vld [vmem:[%s8484_s4 + $0x120] ss:$12 sps:$4 sm:$0xff]   ;;  %v6162_v45 = vld [vmem:[%s8484_s4 + $0xf0] ss:$12 sps:$4 sm:$0xff]  }
 0x12b   :  { %4319 = vmatpush1.bf16.msra.mxu0 %v6096_v37  ;;  %v6164_v37 = vld [vmem:[%s8484_s4 + $0xf4] ss:$12 sps:$4 sm:$0xff]   ;;  %v6165_v46 = vld [vmem:[%s8484_s4 + $0x270] ss:$12 sps:$4 sm:$0xff]  }
 0x12c   :  { %v1995_v52 = vadd.f32 %v1994_v51, %v1952_v49  ;;  %4362 = vmatpush1.bf16.msra.mxu1 %v6099_v44  ;;  %4320 = vmatprep.subr.bf16.mxu0 %v6104_v47  ;;  %v336_v44 = vrot.slane %v7348_v24, %v7628_v38  ;;  %v6170_v47 = vld [vmem:[%s8484_s4 + $0xdc] ss:$12 sps:$4 sm:$0xff]   ;;  %v6168_v51 = vld [vmem:[%s8484_s4 + $0xd8] ss:$12 sps:$4 sm:$0xff]  }
 0x12d   :  { %4363 = vmatprep.subr.bf16.mxu1 %v6107_v48  ;;  %v6173_v49 = vld [vmem:[%s8484_s4 + $0x25c] ss:$12 sps:$4 sm:$0xff]  }
 0x12e   :  { %v2356_v57 = vmax.f32 %v1995_v52, 0.0  ;;  %v1950_v48 = vadd.f32 %v7506_v42, %v336_v44  ;;  %v6176_v42 = vld [vmem:[%s8484_s4 + $0xc4] ss:$12 sps:$4 sm:$0xff]  }
 0x12f   :  { %4321 = vmatpush1.bf16.msra.mxu0 %v6102_v50  ;;  %v1946_v50 = vadd.f32 %v7487_v34, %v336_v44  ;;  %v6179_v34 = vld [vmem:[%s8484_s4 + $0x244] ss:$12 sps:$4 sm:$0xff]   ;;  %v6212_v44 = vld [vmem:[%s8484_s4 + $0x334] ss:$12 sps:$4 sm:$0xff]  }
 0x130   :  { %v7531_v59 = vpack.c.bf16 %v2356_v57, %v2344_v56  ;;  %4364 = vmatpush1.bf16.msra.mxu1 %v6105_v2  ;;  %4322 = vmatprep.subr.bf16.mxu0 %v6110_v53  ;;  %v6171_v2 = vld [vmem:[%s8484_s4 + $0x258] ss:$12 sps:$4 sm:$0xff]   ;;  %v1993_v52 = vadd.f32 %v7508_v43, %v1950_v48  ;;  %v6174_v53 = vld [vmem:[%s8484_s4 + $0xc0] ss:$12 sps:$4 sm:$0xff]   ;;  %v6218_v48 = vld [vmem:[%s8484_s4 + $0x31c] ss:$12 sps:$4 sm:$0xff]  }
 0x131   :  { %4365 = vmatprep.subr.bf16.mxu1 %v6113_v55  ;;  %v1989_v55 = vadd.f32 %v7489_v35, %v1946_v50  ;;  %v6177_v56 = vld [vmem:[%s8484_s4 + $0x240] ss:$12 sps:$4 sm:$0xff]   ;;  %v6180_v35 = vld [vmem:[%s8484_s4 + $0x3a8] ss:$12 sps:$4 sm:$0xff]   ;;  %v6216_v50 = vld [vmem:[%s8484_s4 + $0x318] ss:$12 sps:$4 sm:$0xff]  }
 0x132   :  { %4389 = vmatprep.mubr.bf16.mxu1 %v7531_v59  ;;  %v6182_v43 = vld [vmem:[%s8484_s4 + $0x3ac] ss:$12 sps:$4 sm:$0xff]  }
 0x133   :  { %4323 = vmatpush1.bf16.msra.mxu0 %v6108_v60  ;;  %v6185_v57 = vld [vmem:[%s8484_s4 + $0x52c] ss:$12 sps:$4 sm:$0xff]   ;;  %v2355_v60 = vmax.f32 %v1993_v52, 0.0 }
 0x134   :  { %4366 = vmatpush1.bf16.msra.mxu1 %v6111_v61  ;;  %4324 = vmatprep.subr.bf16.mxu0 %v6116_v62  ;;  %v347_v61 = vsub.s32 5, %v7334_v20  ;;  %v6222_v52 = vld [vmem:[%s8484_s4 + $0x300] ss:$12 sps:$4 sm:$0xff]  }
 0x135   :  { %4367 = vmatprep.subr.bf16.mxu1 %v6119_v0  ;;  %v6183_v0 = vld [vmem:[%s8484_s4 + $0x528] ss:$12 sps:$4 sm:$0xff]  }
 0x137   :  { %4325 = vmatpush1.bf16.msra.mxu0 %v6114_v1  ;;  %v2343_v1 = vmax.f32 %v1989_v55, 0.0  ;;  %v6233_v55 = vld [vmem:[%s8484_s4 + $0x5ec] ss:$12 sps:$4 sm:$0xff]  }
 0x138   :  { %4368 = vmatpush1.bf16.msra.mxu1 %v6117_v54  ;;  %4326 = vmatprep.subr.bf16.mxu0 %v6122_v3  ;;  %v6188_v54 = vld [vmem:[%s8484_s4 + $0x394] ss:$12 sps:$4 sm:$0xff]  }
 0x139   :  { %4369 = vmatprep.subr.bf16.mxu1 %v6125_v4  ;;  %v7699_v3 = vpack.c.bf16 %v2355_v60, %v2343_v1  ;;  %v348_v4 = vrot.slane %v7348_v24, %v347_v61  ;;  %v6236_v60 = vld [vmem:[%s8484_s4 + $0x454] ss:$12 sps:$4 sm:$0xff]  }
 0x13a   :  { %v6468_v61 = vld [vmem:[%s8483_s3] sm:$0xff] }
 0x13b   :  { %4327 = vmatpush1.bf16.msra.mxu0 %v6120_v5  ;;  %v6186_v5 = vld [vmem:[%s8484_s4 + $0x390] ss:$12 sps:$4 sm:$0xff]  }
 0x13c   :  { %4370 = vmatpush1.bf16.msra.mxu1 %v6123_v6  ;;  %4328 = vmatprep.subr.bf16.mxu0 %v6128_v7  ;;  %v6191_v6 = vld [vmem:[%s8484_s4 + $0x514] ss:$12 sps:$4 sm:$0xff]  }
 0x13d   :  { %4371 = vmatprep.subr.bf16.mxu1 %v6131_v8 }
 0x13f   :  { %4329 = vmatpush1.bf16.msra.mxu0 %v6126_v9  ;;  %v6189_v9 = vld [vmem:[%s8484_s4 + $0x510] ss:$12 sps:$4 sm:$0xff]  }
 0x140   :  { %4372 = vmatpush1.bf16.msra.mxu1 %v6129_v10  ;;  %4330 = vmatprep.subr.bf16.mxu0 %v6134_v11  ;;  %v6194_v10 = vld [vmem:[%s8484_s4 + $0x37c] ss:$12 sps:$4 sm:$0xff]  }
 0x141   :  { %4373 = vmatprep.subr.bf16.mxu1 %v6137_v13  ;;  %v6197_v13 = vld [vmem:[%s8484_s4 + $0x4fc] ss:$12 sps:$4 sm:$0xff]  }
 0x143   :  { %4331 = vmatpush2.bf16.msra.mxu0 %v6132_v14  ;;  %v7691_v62 = vpop.f32.mrf.mxu1 }
 0x144   :  { %4374 = vmatpush2.bf16.msra.mxu1 %v6135_v16  ;;  %4332 = vmatprep.subr.bf16.mxu0 %v6140_v17  ;;  %v6192_v17 = vld [vmem:[%s8484_s4 + $0x378] ss:$12 sps:$4 sm:$0xff]  }
 0x145   :  { %4375 = vmatprep.subr.bf16.mxu1 %v6143_v19  ;;  %v2076_v7 = vpop.f32.mrf.mxu1 }
 0x147   :  { %4333 = vmatpush2.bf16.msra.mxu0 %v6138_v18  ;;  %v7721_v14 = vpop.f32.mrf.mxu1  ;;  %v6195_v18 = vld [vmem:[%s8484_s4 + $0x4f8] ss:$12 sps:$4 sm:$0xff]  }
 0x148   :  { %4376 = vmatpush2.bf16.msra.mxu1 %v6141_v21  ;;  %4334 = vmatprep.subr.bf16.mxu0 %v6146_v22  ;;  %v6200_v21 = vld [vmem:[%s8484_s4 + $0x364] ss:$12 sps:$4 sm:$0xff]  }
 0x149   :  { %4377 = vmatprep.subr.bf16.mxu1 %v6149_v27  ;;  %v6203_v27 = vld [vmem:[%s8484_s4 + $0x4e4] ss:$12 sps:$4 sm:$0xff]  }
 0x14b   :  { %4335 = vmatpush2.bf16.msra.mxu0 %v6144_v23 }
 0x14c   :  { %4378 = vmatpush2.bf16.msra.mxu1 %v6147_v28  ;;  %4336 = vmatprep.subr.bf16.mxu0 %v6152_v29  ;;  %v2080_v28 = vpop.f32.mrf.mxu1  ;;  %v6198_v29 = vld [vmem:[%s8484_s4 + $0x360] ss:$12 sps:$4 sm:$0xff]  }
 0x14d   :  { %4379 = vmatprep.subr.bf16.mxu1 %v6155_v32  ;;  %v6201_v32 = vld [vmem:[%s8484_s4 + $0x4e0] ss:$12 sps:$4 sm:$0xff]  }
 0x14f   :  { %4337 = vmatpush2.bf16.msra.mxu0 %v6150_v31 }
 0x150   :  { %4380 = vmatpush2.bf16.msra.mxu1 %v6153_v33  ;;  %4338 = vmatprep.subr.bf16.mxu0 %v6158_v36  ;;  %v6206_v33 = vld [vmem:[%s8484_s4 + $0x34c] ss:$12 sps:$4 sm:$0xff]  }
 0x151   :  { %4381 = vmatprep.subr.bf16.mxu1 %v6161_v40  ;;  %v6204_v40 = vld [vmem:[%s8484_s4 + $0x348] ss:$12 sps:$4 sm:$0xff]  }
 0x153   :  { %4339 = vmatpush2.bf16.msra.mxu0 %v6156_v39 }
 0x154   :  { %4382 = vmatpush2.bf16.msra.mxu1 %v6159_v41  ;;  %4340 = vmatprep.subr.bf16.mxu0 %v6164_v37  ;;  %v6209_v41 = vld [vmem:[%s8484_s4 + $0x4cc] ss:$12 sps:$4 sm:$0xff]   ;;  %v6207_v37 = vld [vmem:[%s8484_s4 + $0x4c8] ss:$12 sps:$4 sm:$0xff]  }
 0x155   :  { %4383 = vmatprep.subr.bf16.mxu1 %v6167_v12 }
 0x157   :  { %4341 = vmatpush2.bf16.msra.mxu0 %v6162_v45  ;;  %v6215_v45 = vld [vmem:[%s8484_s4 + $0x4b4] ss:$12 sps:$4 sm:$0xff]  }
 0x158   :  { %4384 = vmatpush2.bf16.msra.mxu1 %v6165_v46  ;;  %4342 = vmatprep.subr.bf16.mxu0 %v6170_v47  ;;  %v6210_v46 = vld [vmem:[%s8484_s4 + $0x330] ss:$12 sps:$4 sm:$0xff]  }
 0x159   :  { %4385 = vmatprep.subr.bf16.mxu1 %v6173_v49  ;;  %v6213_v47 = vld [vmem:[%s8484_s4 + $0x4b0] ss:$12 sps:$4 sm:$0xff]  }
 0x15a   :  { %v6221_v49 = vld [vmem:[%s8484_s4 + $0x49c] ss:$12 sps:$4 sm:$0xff]  }
 0x15b   :  { %4343 = vmatpush2.bf16.msra.mxu0 %v6168_v51  ;;  %v6219_v51 = vld [vmem:[%s8484_s4 + $0x498] ss:$12 sps:$4 sm:$0xff]  }
 0x15c   :  { %4386 = vmatpush2.bf16.msra.mxu1 %v6171_v2  ;;  %4344 = vmatprep.subr.bf16.mxu0 %v6176_v42  ;;  %v6224_v2 = vld [vmem:[%s8484_s4 + $0x304] ss:$12 sps:$4 sm:$0xff]  }
 0x15d   :  { %4387 = vmatprep.subr.bf16.mxu1 %v6179_v34  ;;  %v6227_v42 = vld [vmem:[%s8484_s4 + $0x484] ss:$12 sps:$4 sm:$0xff]   ;;  %v6225_v34 = vld [vmem:[%s8484_s4 + $0x480] ss:$12 sps:$4 sm:$0xff]  }
 0x15f   :  { %4345 = vmatpush2.bf16.msra.mxu0 %v6174_v53  ;;  %v6230_v53 = vld [vmem:[%s8484_s4 + $0x46c] ss:$12 sps:$4 sm:$0xff]  }
 0x160   :  { %4388 = vmatpush2.bf16.msra.mxu1 %v6177_v56  ;;  %4400 = vmatprep.subr.bf16.mxu0 %v6182_v43  ;;  %v355_v56 = vsub.s32 7, %v7334_v20  ;;  %v6228_v43 = vld [vmem:[%s8484_s4 + $0x468] ss:$12 sps:$4 sm:$0xff]  }
 0x161   :  { %4443 = vmatprep.subr.bf16.mxu1 %v6185_v57  ;;  %v6231_v57 = vld [vmem:[%s8484_s4 + $0x5e8] ss:$12 sps:$4 sm:$0xff]  }
 0x162   :  { %v7708_v8 = vpop.f32.mrf.mxu0  ;;  %4347 = vmatmul.mubr.bf16.vlgmr.msra.gmra.mxu0 %v7411_v58 }
 0x163   :  { %4390 = vmatmul.mubr.bf16.vlgmr.msra.gmra.mxu1 %v7699_v3  ;;  %4401 = vmatpush1.bf16.msra.mxu0 %v6180_v35  ;;  %v356_v35 = vrot.slane %v6468_v61, %v355_v56 }
 0x164   :  { %4444 = vmatpush1.bf16.msra.mxu1 %v6183_v0  ;;  %v2033_v24 = vpop.f32.mrf.mxu0  ;;  %4402 = vmatprep.subr.bf16.mxu0 %v6188_v54  ;;  %v6239_v0 = vld [vmem:[%s8484_s4 + $0x5d4] ss:$12 sps:$4 sm:$0xff]  }
 0x165   :  { %v2034_v11 = vadd.f32 %v2033_v24, %v348_v4  ;;  %4445 = vmatprep.subr.bf16.mxu1 %v6191_v6 }
 0x166   :  { %v7723_v16 = vpop.f32.mrf.mxu0 }
 0x167   :  { %4403 = vmatpush1.bf16.msra.mxu0 %v6186_v5  ;;  %v2077_v22 = vadd.f32 %v2076_v7, %v2034_v11  ;;  %v6237_v7 = vld [vmem:[%s8484_s4 + $0x5d0] ss:$12 sps:$4 sm:$0xff]  }
 0x168   :  { %4446 = vmatpush1.bf16.msra.mxu1 %v6189_v9  ;;  %v2037_v19 = vpop.f32.mrf.mxu0  ;;  %4404 = vmatprep.subr.bf16.mxu0 %v6194_v10  ;;  %v6242_v9 = vld [vmem:[%s8484_s4 + $0x43c] ss:$12 sps:$4 sm:$0xff]  }
 0x169   :  { %v2038_v23 = vadd.f32 %v2037_v19, %v348_v4  ;;  %4447 = vmatprep.subr.bf16.mxu1 %v6197_v13  ;;  %v2346_v36 = vmax.f32 %v2077_v22, 0.0  ;;  %v6234_v4 = vld [vmem:[%s8484_s4 + $0x450] ss:$12 sps:$4 sm:$0xff]  }
 0x16a   :  { %v6245_v10 = vld [vmem:[%s8484_s4 + $0x5bc] ss:$12 sps:$4 sm:$0xff]  }
 0x16b   :  { %v2081_v31 = vadd.f32 %v2080_v28, %v2038_v23  ;;  %4405 = vmatpush1.bf16.msra.mxu0 %v6192_v17  ;;  %v6240_v17 = vld [vmem:[%s8484_s4 + $0x438] ss:$12 sps:$4 sm:$0xff]   ;;  %v343_v28 = vsub.s32 4, %v7334_v20 }
 0x16c   :  { %4448 = vmatpush1.bf16.msra.mxu1 %v6195_v18  ;;  %4406 = vmatprep.subr.bf16.mxu0 %v6200_v21  ;;  %v6243_v18 = vld [vmem:[%s8484_s4 + $0x5b8] ss:$12 sps:$4 sm:$0xff]  }
 0x16d   :  { %v2358_v39 = vmax.f32 %v2081_v31, 0.0  ;;  %4449 = vmatprep.subr.bf16.mxu1 %v6203_v27  ;;  %v6248_v21 = vld [vmem:[%s8484_s4 + $0x424] ss:$12 sps:$4 sm:$0xff]  }
 0x16e   :  { %v6251_v27 = vld [vmem:[%s8484_s4 + $0x5a4] ss:$12 sps:$4 sm:$0xff]  }
 0x16f   :  { %4407 = vmatpush1.bf16.msra.mxu0 %v6198_v29  ;;  %v7755_v12 = vpack.c.bf16 %v2358_v39, %v2346_v36  ;;  %v351_v29 = vsub.s32 6, %v7334_v20  ;;  %v6249_v36 = vld [vmem:[%s8484_s4 + $0x5a0] ss:$12 sps:$4 sm:$0xff]  }
 0x170   :  { %4450 = vmatpush1.bf16.msra.mxu1 %v6201_v32  ;;  %4408 = vmatprep.subr.bf16.mxu0 %v6206_v33  ;;  %v6246_v33 = vld [vmem:[%s8484_s4 + $0x420] ss:$12 sps:$4 sm:$0xff]  }
 0x171   :  { %4432 = vmatprep.mubr.bf16.mxu0 %v7755_v12  ;;  %4451 = vmatprep.subr.bf16.mxu1 %v6209_v41  ;;  %v6254_v39 = vld [vmem:[%s8484_s4 + $0x40c] ss:$12 sps:$4 sm:$0xff]  }
 0x173   :  { %4409 = vmatpush1.bf16.msra.mxu0 %v6204_v40 }
 0x174   :  { %4452 = vmatpush1.bf16.msra.mxu1 %v6207_v37  ;;  %4410 = vmatprep.subr.bf16.mxu0 %v6212_v44  ;;  %v6252_v37 = vld [vmem:[%s8484_s4 + $0x408] ss:$12 sps:$4 sm:$0xff]   ;;  %v6257_v44 = vld [vmem:[%s8484_s4 + $0x58c] ss:$12 sps:$4 sm:$0xff]  }
 0x175   :  { %4453 = vmatprep.subr.bf16.mxu1 %v6215_v45  ;;  %v6255_v45 = vld [vmem:[%s8484_s4 + $0x588] ss:$12 sps:$4 sm:$0xff]  }
 0x177   :  { %4411 = vmatpush1.bf16.msra.mxu0 %v6210_v46 }
 0x178   :  { %4454 = vmatpush1.bf16.msra.mxu1 %v6213_v47  ;;  %4412 = vmatprep.subr.bf16.mxu0 %v6218_v48  ;;  %v6260_v47 = vld [vmem:[%s8484_s4 + $0x3f4] ss:$12 sps:$4 sm:$0xff]  }
 0x179   :  { %4455 = vmatprep.subr.bf16.mxu1 %v6221_v49  ;;  %v6263_v48 = vld [vmem:[%s8484_s4 + $0x574] ss:$12 sps:$4 sm:$0xff]   ;;  %v344_v49 = vrot.slane %v6468_v61, %v343_v28 }
 0x17b   :  { %4413 = vmatpush1.bf16.msra.mxu0 %v6216_v50  ;;  %v352_v50 = vrot.slane %v6468_v61, %v351_v29 }
 0x17c   :  { %4456 = vmatpush1.bf16.msra.mxu1 %v6219_v51  ;;  %4414 = vmatprep.subr.bf16.mxu0 %v6224_v2  ;;  %v6258_v51 = vld [vmem:[%s8484_s4 + $0x3f0] ss:$12 sps:$4 sm:$0xff]  }
 0x17d   :  { %4457 = vmatprep.subr.bf16.mxu1 %v6227_v42 }
 0x17f   :  { %4415 = vmatpush1.bf16.msra.mxu0 %v6222_v52 }
 0x180   :  { %4458 = vmatpush1.bf16.msra.mxu1 %v6225_v34  ;;  %4416 = vmatprep.subr.bf16.mxu0 %v6230_v53 }
 0x181   :  { %4459 = vmatprep.subr.bf16.mxu1 %v6233_v55 }
 0x182   :  { %v7818_v54 = vpop.f32.mrf.mxu0 }
 0x183   :  { %v7816_v1 = vpop.f32.mrf.mxu1  ;;  %4417 = vmatpush2.bf16.msra.mxu0 %v6228_v43 }
 0x184   :  { %4460 = vmatpush2.bf16.msra.mxu1 %v6231_v57  ;;  %v2162_v6 = vpop.f32.mrf.mxu0  ;;  %4418 = vmatprep.subr.bf16.mxu0 %v6236_v60 }
 0x185   :  { %v2119_v5 = vpop.f32.mrf.mxu1  ;;  %4461 = vmatprep.subr.bf16.mxu1 %v6239_v0 }
 0x186   :  { %v2120_v24 = vadd.f32 %v2119_v5, %v356_v35  ;;  %v2164_v13 = vpop.f32.mrf.mxu0 }
 0x187   :  { %v2121_v11 = vpop.f32.mrf.mxu1  ;;  %4419 = vmatpush2.bf16.msra.mxu0 %v6234_v4 }
 0x188   :  { %4462 = vmatpush2.bf16.msra.mxu1 %v6237_v7  ;;  %4420 = vmatprep.subr.bf16.mxu0 %v6242_v9  ;;  %v2163_v22 = vadd.f32 %v2162_v6, %v2120_v24  ;;  %v2166_v31 = vpop.f32.mrf.mxu0 }
 0x189   :  { %v2123_v19 = vpop.f32.mrf.mxu1  ;;  %4463 = vmatprep.subr.bf16.mxu1 %v6245_v10 }
 0x18a   :  { %v2124_v23 = vadd.f32 %v2123_v19, %v356_v35  ;;  %v2348_v40 = vmax.f32 %v2163_v22, 0.0 }
 0x18b   :  { %4421 = vmatpush2.bf16.msra.mxu0 %v6240_v17 }
 0x18c   :  { %v2167_v32 = vadd.f32 %v2166_v31, %v2124_v23  ;;  %4464 = vmatpush2.bf16.msra.mxu1 %v6243_v18  ;;  %4422 = vmatprep.subr.bf16.mxu0 %v6248_v21 }
 0x18d   :  { %4465 = vmatprep.subr.bf16.mxu1 %v6251_v27 }
 0x18e   :  { %v2360_v41 = vmax.f32 %v2167_v32, 0.0 }
 0x18f   :  { %4423 = vmatpush2.bf16.msra.mxu0 %v6246_v33 }
 0x190   :  { %v7864_v46 = vpack.c.bf16 %v2360_v41, %v2348_v40  ;;  %4466 = vmatpush2.bf16.msra.mxu1 %v6249_v36  ;;  %4424 = vmatprep.subr.bf16.mxu0 %v6254_v39 }
 0x191   :  { %4467 = vmatprep.subr.bf16.mxu1 %v6257_v44 }
 0x192   :  { %4475 = vmatprep.mubr.bf16.mxu1 %v7864_v46 }
 0x193   :  { %4425 = vmatpush2.bf16.msra.mxu0 %v6252_v37 }
 0x194   :  { %12 = vsyncpa [#allocation5], 0  ;;  %v2036_v2 = vadd.f32 %v7723_v16, %v344_v49  ;;  %4468 = vmatpush2.bf16.msra.mxu1 %v6255_v45  ;;  %4426 = vmatprep.subr.bf16.mxu0 %v6260_v47  ;;  %v6261_v42 = vld [vmem:[%s8484_s4 + $0x570] ss:$12 sps:$4 sm:$0xff]   ;;  %v2122_v34 = vadd.f32 %v2121_v11, %v352_v50  ;;  %v2032_v55 = vadd.f32 %v7708_v8, %v344_v49  ;;  %v6264_v56 = vld [vmem:[%s8484_s4 + $0x3d8] ss:$12 sps:$4 sm:$0xff]  }
 0x195   :  { %v6266_v52 = vld [vmem:[%s8484_s4 + $0x3dc] ss:$12 sps:$4 sm:$0xff]   ;;  %4469 = vmatprep.subr.bf16.mxu1 %v6263_v48  ;;  %v2118_v16 = vadd.f32 %v7816_v1, %v352_v50  ;;  %v6267_v57 = vld [vmem:[%s8484_s4 + $0x558] ss:$12 sps:$4 sm:$0xff]   ;;  %v6270_v0 = vld [vmem:[%s8484_s4 + $0x3c0] ss:$12 sps:$4 sm:$0xff]  }
 0x196   :  { %v6269_v53 = vld [vmem:[%s8484_s4 + $0x55c] ss:$12 sps:$4 sm:$0xff]   ;;  %v2079_v43 = vadd.f32 %v7721_v14, %v2036_v2  ;;  %v6272_v60 = vld [vmem:[%s8484_s4 + $0x3c4] ss:$12 sps:$4 sm:$0xff]   ;;  %v2165_v8 = vadd.f32 %v2164_v13, %v2122_v34  ;;  %v2075_v35 = vadd.f32 %v7691_v62, %v2032_v55  ;;  %v6273_v4 = vld [vmem:[%s8484_s4 + $0x540] ss:$12 sps:$4 sm:$0xff]  }
 0x197   :  { %4427 = vmatpush2.bf16.msra.mxu0 %v6258_v51  ;;  %v6275_v61 = vld [vmem:[%s8484_s4 + $0x544] ss:$12 sps:$4 sm:$0xff]   ;;  %v2161_v14 = vadd.f32 %v7818_v54, %v2118_v16  ;;  %v6278_v5 = vld [vmem:[%s8484_s4 + $0x6ac] ss:$12 sps:$4 sm:$0xff]   ;;  %v6276_v9 = vld [vmem:[%s8484_s4 + $0x6a8] ss:$12 sps:$4 sm:$0xff]  }
 0x198   :  { %4470 = vmatpush2.bf16.msra.mxu1 %v6261_v42  ;;  %4428 = vmatprep.subr.bf16.mxu0 %v6266_v52  ;;  %v2357_v1 = vmax.f32 %v2079_v43, 0.0  ;;  %v2359_v6 = vmax.f32 %v2165_v8, 0.0  ;;  %v6290_v62 = vld [vmem:[%s8484_s4 + $0x82c] ss:$12 sps:$4 sm:$0xff]   ;;  %v2345_v54 = vmax.f32 %v2075_v35, 0.0 }
 0x199   :  { %4471 = vmatprep.subr.bf16.mxu1 %v6269_v53  ;;  %v2347_v7 = vmax.f32 %v2161_v14, 0.0  ;;  %v6281_v10 = vld [vmem:[%s8484_s4 + $0x694] ss:$12 sps:$4 sm:$0xff]   ;;  %v6279_v18 = vld [vmem:[%s8484_s4 + $0x690] ss:$12 sps:$4 sm:$0xff]  }
 0x19a   :  { %v7918_v24 = vpack.c.bf16 %v2357_v1, %v2345_v54  ;;  %v6288_v11 = vld [vmem:[%s8484_s4 + $0x828] ss:$12 sps:$4 sm:$0xff]   ;;  %v6294_v21 = vld [vmem:[%s8484_s4 + $0x810] ss:$12 sps:$4 sm:$0xff]   ;;  %v6282_v23 = vld [vmem:[%s8484_s4 + $0x678] ss:$12 sps:$4 sm:$0xff]  }
 0x19b   :  { %4429 = vmatpush2.bf16.msra.mxu0 %v6264_v56  ;;  %v7926_v13 = vpack.c.bf16 %v2359_v6, %v2347_v7  ;;  %v6296_v17 = vld [vmem:[%s8484_s4 + $0x814] ss:$12 sps:$4 sm:$0xff]   ;;  %v6284_v19 = vld [vmem:[%s8484_s4 + $0x67c] ss:$12 sps:$4 sm:$0xff]   ;;  %v6287_v27 = vld [vmem:[%s8484_s4 + $0x664] ss:$12 sps:$4 sm:$0xff]  }
 0x19c   :  { %4472 = vmatpush2.bf16.msra.mxu1 %v6267_v57  ;;  %4430 = vmatprep.subr.bf16.mxu0 %v6272_v60  ;;  %v6302_v22 = vld [vmem:[%s8484_s4 + $0x7fc] ss:$12 sps:$4 sm:$0xff]   ;;  %v6300_v28 = vld [vmem:[%s8484_s4 + $0x7f8] ss:$12 sps:$4 sm:$0xff]   ;;  %v6285_v31 = vld [vmem:[%s8484_s4 + $0x660] ss:$12 sps:$4 sm:$0xff]  }
 0x19d   :  { %4473 = vmatprep.subr.bf16.mxu1 %v6275_v61  ;;  %v6308_v29 = vld [vmem:[%s8484_s4 + $0x7e4] ss:$12 sps:$4 sm:$0xff]   ;;  %v6293_v32 = vld [vmem:[%s8484_s4 + $0x64c] ss:$12 sps:$4 sm:$0xff]   ;;  %v6291_v39 = vld [vmem:[%s8484_s4 + $0x648] ss:$12 sps:$4 sm:$0xff]  }
 0x19e   :  { %v6306_v33 = vld [vmem:[%s8484_s4 + $0x7e0] ss:$12 sps:$4 sm:$0xff]   ;;  %v6312_v41 = vld [vmem:[%s8484_s4 + $0x7c8] ss:$12 sps:$4 sm:$0xff]   ;;  %v6297_v44 = vld [vmem:[%s8484_s4 + $0x630] ss:$12 sps:$4 sm:$0xff]  }
 0x19f   :  { %4431 = vmatpush2.bf16.msra.mxu0 %v6270_v0  ;;  %v6314_v36 = vld [vmem:[%s8484_s4 + $0x7cc] ss:$12 sps:$4 sm:$0xff]   ;;  %v6299_v40 = vld [vmem:[%s8484_s4 + $0x634] ss:$12 sps:$4 sm:$0xff]   ;;  %v6305_v45 = vld [vmem:[%s8484_s4 + $0x61c] ss:$12 sps:$4 sm:$0xff]  }
 0x1a0   :  { %4474 = vmatpush2.bf16.msra.mxu1 %v6273_v4  ;;  %4486 = vmatprep.subr.bf16.mxu0 %v6278_v5  ;;  %v6320_v37 = vld [vmem:[%s8484_s4 + $0x7b4] ss:$12 sps:$4 sm:$0xff]   ;;  %v6318_v47 = vld [vmem:[%s8484_s4 + $0x7b0] ss:$12 sps:$4 sm:$0xff]   ;;  %v6303_v49 = vld [vmem:[%s8484_s4 + $0x618] ss:$12 sps:$4 sm:$0xff]  }
 0x1a1   :  { %4529 = vmatprep.subr.bf16.mxu1 %v6290_v62  ;;  %v6326_v48 = vld [vmem:[%s8484_s4 + $0x79c] ss:$12 sps:$4 sm:$0xff]   ;;  %v6311_v50 = vld [vmem:[%s8484_s4 + $0x604] ss:$12 sps:$4 sm:$0xff]   ;;  %v6309_v42 = vld [vmem:[%s8484_s4 + $0x600] ss:$12 sps:$4 sm:$0xff]  }
 0x1a2   :  { %4433 = vmatmul.mubr.bf16.vlgmr.msra.gmra.mxu0 %v7918_v24  ;;  %v6324_v51 = vld [vmem:[%s8484_s4 + $0x798] ss:$12 sps:$4 sm:$0xff]   ;;  %v6330_v34 = vld [vmem:[%s8484_s4 + $0x780] ss:$12 sps:$4 sm:$0xff]   ;;  %v6315_v16 = vld [vmem:[%s8484_s4 + $0x768] ss:$12 sps:$4 sm:$0xff]  }
 0x1a3   :  { %4476 = vmatmul.mubr.bf16.vlgmr.msra.gmra.mxu1 %v7926_v13  ;;  %4487 = vmatpush1.bf16.msra.mxu0 %v6276_v9  ;;  %v6332_v2 = vld [vmem:[%s8484_s4 + $0x784] ss:$12 sps:$4 sm:$0xff]   ;;  %v6317_v52 = vld [vmem:[%s8484_s4 + $0x76c] ss:$12 sps:$4 sm:$0xff]   ;;  %v8017_v55 = vpop.f32.mrf.mxu1  ;;  %v8025_v56 = vld [vmem:[%s8483_s3 + $0x8] sm:$0xf] }
 0x1a4   :  { %4488 = vmatprep.subr.bf16.mxu0 %v6281_v10  ;;  %4530 = vmatpush1.bf16.msra.mxu1 %v6288_v11  ;;  %v6338_v53 = vld [vmem:[%s8484_s4 + $0x8ec] ss:$12 sps:$4 sm:$0xff]   ;;  %v6323_v43 = vld [vmem:[%s8484_s4 + $0x754] ss:$12 sps:$4 sm:$0xff]   ;;  %v364_v60 = vrot.slane %v8025_v56, %v7426_v63  ;;  %v6321_v14 = vld [vmem:[%s8484_s4 + $0x750] ss:$12 sps:$4 sm:$0xff]  }
 0x1a5   :  { %4531 = vmatprep.subr.bf16.mxu1 %v6296_v17  ;;  %v6336_v57 = vld [vmem:[%s8484_s4 + $0x8e8] ss:$12 sps:$4 sm:$0xff]   ;;  %v2248_v61 = vpop.f32.mrf.mxu1  ;;  %v6342_v4 = vld [vmem:[%s8484_s4 + $0x8d0] ss:$12 sps:$4 sm:$0xff]   ;;  %v6327_v7 = vld [vmem:[%s8484_s4 + $0x738] ss:$12 sps:$4 sm:$0xff]  }
 0x1a6   :  { %v6344_v8 = vld [vmem:[%s8484_s4 + $0x8d4] ss:$12 sps:$4 sm:$0xff]   ;;  %v6329_v1 = vld [vmem:[%s8484_s4 + $0x73c] ss:$12 sps:$4 sm:$0xff]   ;;  %v6335_v10 = vld [vmem:[%s8484_s4 + $0x724] ss:$12 sps:$4 sm:$0xff]  }
 0x1a7   :  { %4489 = vmatpush1.bf16.msra.mxu0 %v6279_v18  ;;  %v6350_v6 = vld [vmem:[%s8484_s4 + $0x8bc] ss:$12 sps:$4 sm:$0xff]   ;;  %v2250_v62 = vpop.f32.mrf.mxu1  ;;  %v6348_v11 = vld [vmem:[%s8484_s4 + $0x8b8] ss:$12 sps:$4 sm:$0xff]   ;;  %s4838_s17 = smul.u32 2654435769, %s8480_s0 }
 0x1a8   :  { %4490 = vmatprep.subr.bf16.mxu0 %v6284_v19  ;;  %4532 = vmatpush1.bf16.msra.mxu1 %v6294_v21  ;;  %v6356_v19 = vld [vmem:[%s8484_s4 + $0x8a4] ss:$12 sps:$4 sm:$0xff]  }
 0x1a9   :  { %4533 = vmatprep.subr.bf16.mxu1 %v6302_v22  ;;  %v2252_v21 = vpop.f32.mrf.mxu1 }
 0x1ab   :  { %4491 = vmatpush1.bf16.msra.mxu0 %v6282_v23  ;;  %v6333_v23 = vld [vmem:[%s8484_s4 + $0x720] ss:$12 sps:$4 sm:$0xff]  }
 0x1ac   :  { %4492 = vmatprep.subr.bf16.mxu0 %v6287_v27  ;;  %4534 = vmatpush1.bf16.msra.mxu1 %v6300_v28  ;;  %v6341_v27 = vld [vmem:[%s8484_s4 + $0x70c] ss:$12 sps:$4 sm:$0xff]  }
 0x1ad   :  { %4535 = vmatprep.subr.bf16.mxu1 %v6308_v29  ;;  %v6354_v28 = vld [vmem:[%s8484_s4 + $0x8a0] ss:$12 sps:$4 sm:$0xff]  }
 0x1af   :  { %4493 = vmatpush1.bf16.msra.mxu0 %v6285_v31 }
 0x1b0   :  { %4494 = vmatprep.subr.bf16.mxu0 %v6293_v32  ;;  %4536 = vmatpush1.bf16.msra.mxu1 %v6306_v33  ;;  %v6362_v32 = vld [vmem:[%s8484_s4 + $0x88c] ss:$12 sps:$4 sm:$0xff]  }
 0x1b1   :  { %4537 = vmatprep.subr.bf16.mxu1 %v6314_v36  ;;  %v6339_v36 = vld [vmem:[%s8484_s4 + $0x708] ss:$12 sps:$4 sm:$0xff]  }
 0x1b3   :  { %4495 = vmatpush1.bf16.msra.mxu0 %v6291_v39  ;;  %v6347_v39 = vld [vmem:[%s8484_s4 + $0x6f4] ss:$12 sps:$4 sm:$0xff]  }
 0x1b4   :  { %4496 = vmatprep.subr.bf16.mxu0 %v6299_v40  ;;  %4538 = vmatpush1.bf16.msra.mxu1 %v6312_v41  ;;  %v6360_v40 = vld [vmem:[%s8484_s4 + $0x888] ss:$12 sps:$4 sm:$0xff]  }
 0x1b5   :  { %4539 = vmatprep.subr.bf16.mxu1 %v6320_v37  ;;  %v6367_v41 = vld [vmem:[%s8484_s4 + $0x874] ss:$12 sps:$4 sm:$0xff]   ;;  %v360_v37 = vrot.slane %v8025_v56, %v7351_v25 }
 0x1b7   :  { %4497 = vmatpush1.bf16.msra.mxu0 %v6297_v44  ;;  %v6345_v44 = vld [vmem:[%s8484_s4 + $0x6f0] ss:$12 sps:$4 sm:$0xff]  }
 0x1b8   :  { %4498 = vmatprep.subr.bf16.mxu0 %v6305_v45  ;;  %4540 = vmatpush1.bf16.msra.mxu1 %v6318_v47  ;;  %v6353_v47 = vld [vmem:[%s8484_s4 + $0x6dc] ss:$12 sps:$4 sm:$0xff]  }
 0x1b9   :  { %4541 = vmatprep.subr.bf16.mxu1 %v6326_v48  ;;  %v6365_v48 = vld [vmem:[%s8484_s4 + $0x870] ss:$12 sps:$4 sm:$0xff]  }
 0x1bb   :  { %4499 = vmatpush1.bf16.msra.mxu0 %v6303_v49  ;;  %v6372_v49 = vld [vmem:[%s8484_s4 + $0x85c] ss:$12 sps:$4 sm:$0xff]  }
 0x1bc   :  { %4500 = vmatprep.subr.bf16.mxu0 %v6311_v50  ;;  %4542 = vmatpush1.bf16.msra.mxu1 %v6324_v51  ;;  %v6351_v51 = vld [vmem:[%s8484_s4 + $0x6d8] ss:$12 sps:$4 sm:$0xff]  }
 0x1bd   :  { %4543 = vmatprep.subr.bf16.mxu1 %v6332_v2 }
 0x1bf   :  { %4501 = vmatpush1.bf16.msra.mxu0 %v6309_v42  ;;  %v6359_v42 = vld [vmem:[%s8484_s4 + $0x6c4] ss:$12 sps:$4 sm:$0xff]  }
 0x1c0   :  { %4502 = vmatprep.subr.bf16.mxu0 %v6317_v52  ;;  %4544 = vmatpush1.bf16.msra.mxu1 %v6330_v34  ;;  %v6370_v52 = vld [vmem:[%s8484_s4 + $0x858] ss:$12 sps:$4 sm:$0xff]  }
 0x1c1   :  { %4545 = vmatprep.subr.bf16.mxu1 %v6338_v53  ;;  %v6377_v34 = vld [vmem:[%s8484_s4 + $0x844] ss:$12 sps:$4 sm:$0xff]  }
 0x1c2   :  { %v2203_v35 = vpop.f32.mrf.mxu0 }
 0x1c3   :  { %4503 = vmatpush2.bf16.msra.mxu0 %v6315_v16  ;;  %v2204_v50 = vadd.f32 %v2203_v35, %v360_v37  ;;  %v6357_v16 = vld [vmem:[%s8484_s4 + $0x6c0] ss:$12 sps:$4 sm:$0xff]  }
 0x1c4   :  { %v2205_v0 = vpop.f32.mrf.mxu0  ;;  %4504 = vmatprep.subr.bf16.mxu0 %v6323_v43  ;;  %4546 = vmatpush2.bf16.msra.mxu1 %v6336_v57  ;;  %v6363_v57 = vld [vmem:[%s8484_s4 + $0x170] ss:$12 sps:$4 sm:$0xff]  }
 0x1c5   :  { %v2206_v5 = vadd.f32 %v2205_v0, %v364_v60  ;;  %4547 = vmatprep.subr.bf16.mxu1 %v6344_v8  ;;  %v2247_v53 = vadd.f32 %v8017_v55, %v2204_v50  ;;  %v6380_v55 = vld [vmem:[%s8484_s4 + $0x2f0] ss:$12 sps:$4 sm:$0xff]   ;;  %v372_v0 = vrot.slane %v8025_v56, %v339_v26  ;;  %v6373_v26 = vld [vmem:[%s8484_s4 + $0x140] ss:$12 sps:$4 sm:$0xff]   ;;  %v6387_v50 = vld [vmem:[%s8484_s4 + $0x38] ss:$12 sps:$4 sm:$0xff]  }
 0x1c6   :  { %v2207_v54 = vpop.f32.mrf.mxu0 }
 0x1c7   :  { %4505 = vmatpush2.bf16.msra.mxu0 %v6321_v14  ;;  %v2249_v17 = vadd.f32 %v2248_v61, %v2206_v5  ;;  %v2208_v45 = vadd.f32 %v2207_v54, %v360_v37  ;;  %v2349_v8 = vmax.f32 %v2247_v53, 0.0  ;;  %v6364_v61 = vld [vmem:[%s8484_s4 + $0xb0] ss:$12 sps:$4 sm:$0xff]   ;;  %v6368_v14 = vld [vmem:[%s8484_s4 + $0x158] ss:$12 sps:$4 sm:$0xff]  }
 0x1c8   :  { %v2209_v9 = vpop.f32.mrf.mxu0  ;;  %4506 = vmatprep.subr.bf16.mxu0 %v6329_v1  ;;  %4548 = vmatpush2.bf16.msra.mxu1 %v6342_v4  ;;  %v368_v1 = vrot.slane %v8025_v56, %v7628_v38  ;;  %v6382_v37 = vld [vmem:[%s8484_s4 + $0x230] ss:$12 sps:$4 sm:$0xff]   ;;  %v6394_v53 = vld [vmem:[%s8484_s4 + $0x1e8] ss:$12 sps:$4 sm:$0xff]  }
 0x1c9   :  { %v2210_v18 = vadd.f32 %v2209_v9, %v364_v60  ;;  %4549 = vmatprep.subr.bf16.mxu1 %v6350_v6  ;;  %v2350_v29 = vmax.f32 %v2249_v17, 0.0  ;;  %v2251_v2 = vadd.f32 %v2250_v62, %v2208_v45  ;;  %v6375_v60 = vld [vmem:[%s8484_s4 + $0x840] ss:$12 sps:$4 sm:$0xff]   ;;  %v6369_v6 = vld [vmem:[%s8484_s4 + $0x98] ss:$12 sps:$4 sm:$0xff]  }
 0x1cb   :  { %v2253_v22 = vadd.f32 %v2252_v21, %v2210_v18  ;;  %4507 = vmatpush2.bf16.msra.mxu0 %v6327_v7  ;;  %v2361_v43 = vmax.f32 %v2251_v2, 0.0  ;;  %v6378_v18 = vld [vmem:[%s8484_s4 + $0x128] ss:$12 sps:$4 sm:$0xff]   ;;  %v6389_v2 = vld [vmem:[%s8484_s4 + $0xe0] ss:$12 sps:$4 sm:$0xff]  }
 0x1cc   :  { %4508 = vmatprep.subr.bf16.mxu0 %v6335_v10  ;;  %4550 = vmatpush2.bf16.msra.mxu1 %v6348_v11 }
 0x1cd   :  { %v2362_v31 = vmax.f32 %v2253_v22, 0.0  ;;  %4551 = vmatprep.subr.bf16.mxu1 %v6356_v19  ;;  %v8131_v35 = vpack.c.bf16 %v2361_v43, %v2349_v8  ;;  %v6396_v43 = vld [vmem:[%s8484_s4 + $0x290] ss:$12 sps:$4 sm:$0xff]   ;;  %v6400_v8 = vld [vmem:[%s8484_s4 + $0x278] ss:$12 sps:$4 sm:$0xff]  }
 0x1cf   :  { %4509 = vmatpush2.bf16.msra.mxu0 %v6333_v23  ;;  %v8074_v33 = vpack.c.bf16 %v2362_v31, %v2350_v29  ;;  %v6379_v29 = vld [vmem:[%s8484_s4 + $0x68] ss:$12 sps:$4 sm:$0xff]  }
 0x1d0   :  { %4510 = vmatprep.subr.bf16.mxu0 %v6341_v27  ;;  %4552 = vmatpush2.bf16.msra.mxu1 %v6354_v28 }
 0x1d1   :  { %4518 = vmatprep.mubr.bf16.mxu0 %v8074_v33  ;;  %4553 = vmatprep.subr.bf16.mxu1 %v6362_v32  ;;  %v6381_v32 = vld [vmem:[%s8484_s4 + $0x110] ss:$12 sps:$4 sm:$0xff]  }
 0x1d3   :  { %4511 = vmatpush2.bf16.msra.mxu0 %v6339_v36 }
 0x1d4   :  { %4512 = vmatprep.subr.bf16.mxu0 %v6347_v39  ;;  %4554 = vmatpush2.bf16.msra.mxu1 %v6360_v40 }
 0x1d5   :  { %4555 = vmatprep.subr.bf16.mxu1 %v6367_v41 }
 0x1d7   :  { %4513 = vmatpush2.bf16.msra.mxu0 %v6345_v44  ;;  %v6383_v44 = vld [vmem:[%s8484_s4 + $0x50] ss:$12 sps:$4 sm:$0xff]  }
 0x1d8   :  { %4514 = vmatprep.subr.bf16.mxu0 %v6353_v47  ;;  %4556 = vmatpush2.bf16.msra.mxu1 %v6365_v48  ;;  %v6384_v47 = vld [vmem:[%s8484_s4 + $0x2d8] ss:$12 sps:$4 sm:$0xff]  }
 0x1d9   :  { %4557 = vmatprep.subr.bf16.mxu1 %v6372_v49  ;;  %v6385_v48 = vld [vmem:[%s8484_s4 + $0xf8] ss:$12 sps:$4 sm:$0xff]  }
 0x1da   :  { %v6386_v49 = vld [vmem:[%s8484_s4 + $0x218] ss:$12 sps:$4 sm:$0xff]  }
 0x1db   :  { %4515 = vmatpush2.bf16.msra.mxu0 %v6351_v51  ;;  %v6388_v51 = vld [vmem:[%s8484_s4 + $0x2c0] ss:$12 sps:$4 sm:$0xff]  }
 0x1dc   :  { %4516 = vmatprep.subr.bf16.mxu0 %v6359_v42  ;;  %4558 = vmatpush2.bf16.msra.mxu1 %v6370_v52  ;;  %v6390_v42 = vld [vmem:[%s8484_s4 + $0x200] ss:$12 sps:$4 sm:$0xff]   ;;  %v6392_v52 = vld [vmem:[%s8484_s4 + $0x2a8] ss:$12 sps:$4 sm:$0xff]  }
 0x1dd   :  { %4559 = vmatprep.subr.bf16.mxu1 %v6377_v34  ;;  %v6393_v34 = vld [vmem:[%s8484_s4 + $0xc8] ss:$12 sps:$4 sm:$0xff]  }
 0x1df   :  { %4517 = vmatpush2.bf16.msra.mxu0 %v6357_v16  ;;  %v6395_v16 = vld [vmem:[%s8484_s4 + $0x8] ss:$12 sps:$4 sm:$0xff]  }
 0x1e0   :  { %5516 = vmatprep.subr.bf16.mxu0 %v6363_v57  ;;  %4560 = vmatpush2.bf16.msra.mxu1 %v6375_v60  ;;  %v6398_v57 = vld [vmem:[%s8484_s4 + $0x470] ss:$12 sps:$4 sm:$0xff]  }
 0x1e1   :  { %5538 = vmatprep.subr.bf16.mxu1 %v6380_v55  ;;  %v6397_v60 = vld [vmem:[%s8484_s4 + $0x1d0] ss:$12 sps:$4 sm:$0xff]  }
 0x1e2   :  { %v2332_v5 = vpop.f32.mrf.mxu0  ;;  %4519 = vmatmul.mubr.bf16.vlgmr.msra.gmra.mxu0 %v8131_v35  ;;  %v6399_v55 = vld [vmem:[%s8484_s4 + $0x3b0] ss:$12 sps:$4 sm:$0xff]  }
 0x1e3   :  { %v2289_v4 = vpop.f32.mrf.mxu1  ;;  %5517 = vmatpush3.bf16.msra.mxu0 %v6364_v61  ;;  %4604 = vmatprep.mubr.bf16.mxu0 %v7476_v30  ;;  %v6374_v30 = vld [vmem:[%s8484_s4 + $0x80] ss:$12 sps:$4 sm:$0xff]   ;;  %v6402_v61 = vld [vmem:[%s8484_s4 + $0x458] ss:$12 sps:$4 sm:$0xff]  }
 0x1e4   :  { %v2334_v54 = vpop.f32.mrf.mxu0  ;;  %5518 = vmatprep.subr.bf16.mxu0 %v6368_v14  ;;  %v2290_v56 = vadd.f32 %v2289_v4, %v368_v1  ;;  %v6401_v14 = vld [vmem:[%s8484_s4 + $0x1b8] ss:$12 sps:$4 sm:$0xff]   ;;  %v6405_v4 = vld [vmem:[%s8484_s4 + $0x1a0] ss:$12 sps:$4 sm:$0xff]  }
 0x1e5   :  { %v2291_v62 = vpop.f32.mrf.mxu1 }
 0x1e6   :  { %v2292_v7 = vadd.f32 %v2291_v62, %v372_v0  ;;  %v2336_v10 = vpop.f32.mrf.mxu0  ;;  %v2333_v23 = vadd.f32 %v2332_v5, %v2290_v56  ;;  %v6408_v5 = vld [vmem:[%s8484_s4 + $0x248] ss:$12 sps:$4 sm:$0xff]   ;;  %v6414_v56 = vld [vmem:[%s8484_s4 + $0x530] ss:$12 sps:$4 sm:$0xff]  }
 0x1e7   :  { %v2293_v9 = vpop.f32.mrf.mxu1  ;;  %5519 = vmatpush3.bf16.msra.mxu0 %v6369_v6  ;;  %v6410_v6 = vld [vmem:[%s8484_s4 + $0x428] ss:$12 sps:$4 sm:$0xff]  }
 0x1e8   :  { %v2294_v11 = vadd.f32 %v2293_v9, %v368_v1  ;;  %5520 = vmatprep.subr.bf16.mxu0 %v6373_v26  ;;  %v2335_v19 = vadd.f32 %v2334_v54, %v2292_v7  ;;  %v2338_v27 = vpop.f32.mrf.mxu0  ;;  %v2351_v40 = vmax.f32 %v2333_v23, 0.0  ;;  %v6404_v1 = vld [vmem:[%s8484_s4 + $0x260] ss:$12 sps:$4 sm:$0xff]   ;;  %v6409_v62 = vld [vmem:[%s8484_s4 + $0x188] ss:$12 sps:$4 sm:$0xff]  }
 0x1e9   :  { %v2295_v17 = vpop.f32.mrf.mxu1  ;;  %v6411_v54 = vld [vmem:[%s8484_s4 + $0x368] ss:$12 sps:$4 sm:$0xff]   ;;  %v6412_v26 = vld [vmem:[%s8484_s4 + $0x5f0] ss:$12 sps:$4 sm:$0xff]  }
 0x1ea   :  { %v2337_v21 = vadd.f32 %v2336_v10, %v2294_v11  ;;  %v2296_v22 = vadd.f32 %v2295_v17, %v372_v0  ;;  %v2352_v36 = vmax.f32 %v2335_v19, 0.0  ;;  %v6403_v0 = vld [vmem:[%s8484_s4 + $0x398] ss:$12 sps:$4 sm:$0xff]   ;;  %v6413_v7 = vld [vmem:[%s8484_s4 + $0x410] ss:$12 sps:$4 sm:$0xff]  }
 0x1eb   :  { %5521 = vmatpush3.bf16.msra.mxu0 %v6374_v30  ;;  %v6415_v9 = vld [vmem:[%s8484_s4 + $0x350] ss:$12 sps:$4 sm:$0xff]   ;;  %v6416_v10 = vld [vmem:[%s8484_s4 + $0x5d8] ss:$12 sps:$4 sm:$0xff]   ;;  %v6423_v19 = vld [vmem:[%s8484_s4 + $0x320] ss:$12 sps:$4 sm:$0xff]  }
 0x1ec   :  { %v2339_v28 = vadd.f32 %v2338_v27, %v2296_v22  ;;  %v2363_v31 = vmax.f32 %v2337_v21, 0.0  ;;  %5522 = vmatprep.subr.bf16.mxu0 %v6378_v18  ;;  %v6417_v11 = vld [vmem:[%s8484_s4 + $0x3f8] ss:$12 sps:$4 sm:$0xff]   ;;  %v6420_v18 = vld [vmem:[%s8484_s4 + $0x5c0] ss:$12 sps:$4 sm:$0xff]  }
 0x1ed   :  { %v6418_v30 = vld [vmem:[%s8484_s4 + $0x518] ss:$12 sps:$4 sm:$0xff]   ;;  %v6424_v21 = vld [vmem:[%s8484_s4 + $0x5a8] ss:$12 sps:$4 sm:$0xff]  }
 0x1ee   :  { %v2364_v39 = vmax.f32 %v2339_v28, 0.0  ;;  %v8169_v45 = vpack.c.bf16 %v2363_v31, %v2351_v40  ;;  %v6419_v17 = vld [vmem:[%s8484_s4 + $0x338] ss:$12 sps:$4 sm:$0xff]   ;;  %v6425_v22 = vld [vmem:[%s8484_s4 + $0x3c8] ss:$12 sps:$4 sm:$0xff]  }
 0x1ef   :  { %5523 = vmatpush3.bf16.msra.mxu0 %v6379_v29  ;;  %v6426_v23 = vld [vmem:[%s8484_s4 + $0x4e8] ss:$12 sps:$4 sm:$0xff]   ;;  %v6428_v28 = vld [vmem:[%s8484_s4 + $0x590] ss:$12 sps:$4 sm:$0xff]   ;;  %v6433_v40 = vld [vmem:[%s8484_s4 + $0x4b8] ss:$12 sps:$4 sm:$0xff]  }
 0x1f0   :  { %v8161_v41 = vpack.c.bf16 %v2364_v39, %v2352_v36  ;;  %5524 = vmatprep.subr.bf16.mxu0 %v6381_v32  ;;  %v6427_v27 = vld [vmem:[%s8484_s4 + $0x308] ss:$12 sps:$4 sm:$0xff]   ;;  %v6430_v29 = vld [vmem:[%s8484_s4 + $0x770] ss:$12 sps:$4 sm:$0xff]   ;;  %v6432_v36 = vld [vmem:[%s8484_s4 + $0x578] ss:$12 sps:$4 sm:$0xff]  }
 0x1f1   :  { %v6429_v31 = vld [vmem:[%s8484_s4 + $0x4d0] ss:$12 sps:$4 sm:$0xff]   ;;  %v6434_v39 = vld [vmem:[%s8484_s4 + $0x758] ss:$12 sps:$4 sm:$0xff]  }
 0x1f2   :  { %4561 = vmatprep.mubr.bf16.mxu1 %v8161_v41  ;;  %v6431_v32 = vld [vmem:[%s8484_s4 + $0x6b0] ss:$12 sps:$4 sm:$0xff]  }
 0x1f3   :  { %4562 = vmatmul.mubr.bf16.vlgmr.msra.gmra.mxu1 %v8169_v45  ;;  %5525 = vmatpush3.bf16.msra.mxu0 %v6383_v44  ;;  %v6436_v44 = vld [vmem:[%s8484_s4 + $0x560] ss:$12 sps:$4 sm:$0xff]  }
 0x1f4   :  { %5539 = vmatpush3.bf16.msra.mxu1 %v6382_v37  ;;  %4645 = vmatprep.mubr.bf16.mxu1 %v7531_v59  ;;  %v6391_v59 = vld [vmem:[%s8484_s4 + $0x20] ss:$12 sps:$4 sm:$0xff]   ;;  %v6435_v37 = vld [vmem:[%s8484_s4 + $0x698] ss:$12 sps:$4 sm:$0xff]  }
 0x1f5   :  { %5540 = vmatprep.subr.bf16.mxu1 %v6384_v47  ;;  %5526 = vmatprep.subr.bf16.mxu0 %v6385_v48  ;;  %v6437_v47 = vld [vmem:[%s8484_s4 + $0x4a0] ss:$12 sps:$4 sm:$0xff]   ;;  %v6440_v48 = vld [vmem:[%s8484_s4 + $0x548] ss:$12 sps:$4 sm:$0xff]  }
 0x1f7   :  { %5527 = vmatpush3.bf16.msra.mxu0 %v6387_v50  ;;  %v6441_v50 = vld [vmem:[%s8484_s4 + $0x488] ss:$12 sps:$4 sm:$0xff]  }
 0x1f8   :  { %5541 = vmatpush3.bf16.msra.mxu1 %v6386_v49  ;;  %5528 = vmatprep.subr.bf16.mxu0 %v6389_v2  ;;  %v6442_v49 = vld [vmem:[%s8484_s4 + $0x728] ss:$12 sps:$4 sm:$0xff]   ;;  %v6444_v2 = vld [vmem:[%s8484_s4 + $0x8f0] ss:$12 sps:$4 sm:$0xff]  }
 0x1f9   :  { %5542 = vmatprep.subr.bf16.mxu1 %v6388_v51  ;;  %v6443_v51 = vld [vmem:[%s8484_s4 + $0x668] ss:$12 sps:$4 sm:$0xff]  }
 0x1fb   :  { %5529 = vmatpush3.bf16.msra.mxu0 %v6391_v59  ;;  %v6446_v59 = vld [vmem:[%s8484_s4 + $0x830] ss:$12 sps:$4 sm:$0xff]  }
 0x1fc   :  { %5543 = vmatpush3.bf16.msra.mxu1 %v6390_v42  ;;  %5530 = vmatprep.subr.bf16.mxu0 %v6393_v34  ;;  %v6445_v42 = vld [vmem:[%s8484_s4 + $0x710] ss:$12 sps:$4 sm:$0xff]   ;;  %v6448_v34 = vld [vmem:[%s8484_s4 + $0x8d8] ss:$12 sps:$4 sm:$0xff]  }
 0x1fd   :  { %5544 = vmatprep.subr.bf16.mxu1 %v6392_v52  ;;  %v6447_v52 = vld [vmem:[%s8484_s4 + $0x650] ss:$12 sps:$4 sm:$0xff]  }
 0x1ff   :  { %5531 = vmatpush3.bf16.msra.mxu0 %v6395_v16  ;;  %v6450_v16 = vld [vmem:[%s8484_s4 + $0x818] ss:$12 sps:$4 sm:$0xff]  }
 0x200   :  { %5545 = vmatpush3.bf16.msra.mxu1 %v6394_v53  ;;  %5560 = vmatprep.subr.bf16.mxu0 %v6398_v57  ;;  %v6449_v53 = vld [vmem:[%s8484_s4 + $0x6f8] ss:$12 sps:$4 sm:$0xff]   ;;  %v6452_v57 = vld [vmem:[%s8484_s4 + $0x8c0] ss:$12 sps:$4 sm:$0xff]  }
 0x201   :  { %5546 = vmatprep.subr.bf16.mxu1 %v6396_v43  ;;  %v6451_v43 = vld [vmem:[%s8484_s4 + $0x638] ss:$12 sps:$4 sm:$0xff]  }
 0x202   :  { %4605 = vmatmul.mubr.bf16.vlgmr.msra.gmra.mxu0 %v7411_v58  ;;  %v6406_v58 = vld [vmem:[%s8484_s4 + $0x440] ss:$12 sps:$4 sm:$0xff]  }
 0x203   :  { %5561 = vmatpush3.bf16.msra.mxu0 %v6399_v55  ;;  %4686 = vmatprep.mubr.bf16.mxu0 %v7755_v12  ;;  %v6407_v12 = vld [vmem:[%s8484_s4 + $0x380] ss:$12 sps:$4 sm:$0xff]   ;;  %v6456_v55 = vld [vmem:[%s8484_s4 + $0x8a8] ss:$12 sps:$4 sm:$0xff]  }
 0x204   :  { %5547 = vmatpush3.bf16.msra.mxu1 %v6397_v60  ;;  %5562 = vmatprep.subr.bf16.mxu0 %v6402_v61  ;;  %v6455_v60 = vld [vmem:[%s8484_s4 + $0x620] ss:$12 sps:$4 sm:$0xff]   ;;  %v6458_v61 = vld [vmem:[%s8484_s4 + $0x7e8] ss:$12 sps:$4 sm:$0xff]  }
 0x205   :  { %5548 = vmatprep.subr.bf16.mxu1 %v6400_v8  ;;  %v6457_v8 = vld [vmem:[%s8484_s4 + $0x6c8] ss:$12 sps:$4 sm:$0xff]  }
 0x207   :  { %5563 = vmatpush3.bf16.msra.mxu0 %v6403_v0  ;;  %v6460_v0 = vld [vmem:[%s8484_s4 + $0x890] ss:$12 sps:$4 sm:$0xff]  }
 0x208   :  { %5549 = vmatpush3.bf16.msra.mxu1 %v6401_v14  ;;  %5564 = vmatprep.subr.bf16.mxu0 %v6406_v58  ;;  %v6459_v14 = vld [vmem:[%s8484_s4 + $0x608] ss:$12 sps:$4 sm:$0xff]   ;;  %v6462_v58 = vld [vmem:[%s8484_s4 + $0x878] ss:$12 sps:$4 sm:$0xff]  }
 0x209   :  { %5550 = vmatprep.subr.bf16.mxu1 %v6404_v1  ;;  %v6461_v1 = vld [vmem:[%s8484_s4 + $0x7d0] ss:$12 sps:$4 sm:$0xff]  }
 0x20b   :  { %5565 = vmatpush3.bf16.msra.mxu0 %v6407_v12  ;;  %v6464_v12 = vld [vmem:[%s8484_s4 + $0x860] ss:$12 sps:$4 sm:$0xff]  }
 0x20c   :  { %5551 = vmatpush3.bf16.msra.mxu1 %v6405_v4  ;;  %5566 = vmatprep.subr.bf16.mxu0 %v6410_v6  ;;  %v6463_v4 = vld [vmem:[%s8484_s4 + $0x7b8] ss:$12 sps:$4 sm:$0xff]   ;;  %v6467_v6 = vld [vmem:[%s8484_s4 + $0x788] ss:$12 sps:$4 sm:$0xff]  }
 0x20d   :  { %5552 = vmatprep.subr.bf16.mxu1 %v6408_v5  ;;  %v6465_v5 = vld [vmem:[%s8484_s4 + $0x7a0] ss:$12 sps:$4 sm:$0xff]  }
 0x20f   :  { %5567 = vmatpush3.bf16.msra.mxu0 %v6411_v54  ;;  %v8440_v54 = vmul.u32 384, %v7334_v20 }
 0x210   :  { %5553 = vmatpush3.bf16.msra.mxu1 %v6409_v62  ;;  %5568 = vmatprep.subr.bf16.mxu0 %v6413_v7  ;;  %v8437_v62 = vand.u32 127, %v325_v15 }
 0x211   :  { %5582 = vmatprep.subr.bf16.mxu1 %v6412_v26  ;;  %v4820_v26 = vadd.s32 8, %v7334_v20 }
 0x212   :  { %v4823_v7 = vadd.s32 128, %v8437_v62 }
 0x213   :  { %4646 = vmatmul.mubr.bf16.vlgmr.msra.gmra.mxu1 %v7699_v3  ;;  %5569 = vmatpush3.bf16.msra.mxu0 %v6415_v9  ;;  %v6421_v3 = vld [vmem:[%s8484_s4 + $0x3e0] ss:$12 sps:$4 sm:$0xff]   ;;  %v8449_v9 = vmul.u32 384, %v4820_v26 }
 0x214   :  { %5583 = vmatpush3.bf16.msra.mxu1 %v6414_v56  ;;  %4727 = vmatprep.mubr.bf16.mxu1 %v7864_v46  ;;  %v6422_v46 = vld [vmem:[%s8484_s4 + $0x500] ss:$12 sps:$4 sm:$0xff]   ;;  %v4831_v56 = vadd.s32 %v8440_v54, %v8437_v62  ;;  %v4832_v15 = vadd.s32 %v8440_v54, %v4823_v7 }
 0x215   :  { %5584 = vmatprep.subr.bf16.mxu1 %v6416_v10  ;;  %5570 = vmatprep.subr.bf16.mxu0 %v6417_v11  ;;  %v4834_v20 = vadd.s32 %v8449_v9, %v8437_v62 }
 0x217   :  { %5571 = vmatpush3.bf16.msra.mxu0 %v6419_v17  ;;  %v4835_v17 = vadd.s32 %v8449_v9, %v4823_v7 }
 0x218   :  { %5585 = vmatpush3.bf16.msra.mxu1 %v6418_v30  ;;  %5572 = vmatprep.subr.bf16.mxu0 %v6421_v3 }
 0x219   :  { %5586 = vmatprep.subr.bf16.mxu1 %v6420_v18 }
 0x21b   :  { %5573 = vmatpush3.bf16.msra.mxu0 %v6423_v19 }
 0x21c   :  { %5587 = vmatpush3.bf16.msra.mxu1 %v6422_v46  ;;  %5574 = vmatprep.subr.bf16.mxu0 %v6425_v22 }
 0x21d   :  { %5588 = vmatprep.subr.bf16.mxu1 %v6424_v21 }
 0x21f   :  { %5575 = vmatpush3.bf16.msra.mxu0 %v6427_v27 }
 0x220   :  { %5589 = vmatpush3.bf16.msra.mxu1 %v6426_v23  ;;  %5604 = vmatprep.subr.bf16.mxu0 %v6430_v29 }
 0x221   :  { %5590 = vmatprep.subr.bf16.mxu1 %v6428_v28 }
 0x222   :  { %4687 = vmatmul.mubr.bf16.vlgmr.msra.gmra.mxu0 %v7918_v24  ;;  %v6438_v24 = vld [vmem:[%s8484_s4 + $0x740] ss:$12 sps:$4 sm:$0xff]   ;;  %v4348_v10 = vpop.f32.mrf.mxu0 }
 0x223   :  { %5605 = vmatpush3.bf16.msra.mxu0 %v6431_v32  ;;  %4768 = vmatprep.mubr.bf16.mxu0 %v8074_v33  ;;  %v6439_v33 = vld [vmem:[%s8484_s4 + $0x680] ss:$12 sps:$4 sm:$0xff]   ;;  %v4391_v28 = vpop.f32.mrf.mxu1 }
 0x224   :  { %5591 = vmatpush3.bf16.msra.mxu1 %v6429_v31  ;;  %5606 = vmatprep.subr.bf16.mxu0 %v6434_v39  ;;  %v4350_v18 = vpop.f32.mrf.mxu0 }
 0x225   :  { %5592 = vmatprep.subr.bf16.mxu1 %v6432_v36 }
 0x226   :  { %v4352_v22 = vpop.f32.mrf.mxu0 }
 0x227   :  { %5607 = vmatpush3.bf16.msra.mxu0 %v6435_v37 }
 0x228   :  { %5593 = vmatpush3.bf16.msra.mxu1 %v6433_v40  ;;  %5608 = vmatprep.subr.bf16.mxu0 %v6438_v24  ;;  %v4354_v32 = vpop.f32.mrf.mxu0  ;;  %v4393_v40 = vpop.f32.mrf.mxu1 }
 0x229   :  { %5594 = vmatprep.subr.bf16.mxu1 %v6436_v44 }
 0x22b   :  { %5609 = vmatpush3.bf16.msra.mxu0 %v6439_v33 }
 0x22c   :  { %5595 = vmatpush3.bf16.msra.mxu1 %v6437_v47  ;;  %5610 = vmatprep.subr.bf16.mxu0 %v6442_v49  ;;  %v4395_v49 = vpop.f32.mrf.mxu1 }
 0x22d   :  { %5596 = vmatprep.subr.bf16.mxu1 %v6440_v48  ;;  %v8464_v48 = vld [vmem:[%s8485_s5] sm:$0x7]  ;;  %s6492_s5 = smov [#allocation4]  }
 0x22e   :  { %s4929_s18 = sshll.u32 %s6492_s5, 4  ;;  %s4930_s18 = int_to_ptr.vmem [resolvable:$true] %s4929_s18 }
 0x22f   :  { %5611 = vmatpush3.bf16.msra.mxu0 %v6443_v51  ;;  %s6469_s19 = scalar_lea.vmem %s4930_s18, 768  ;;  %p6474_p1 = scmp.lt.s32.totalorder %s4930_s18, %s4930_s18 }
 0x230   :  { %5597 = vmatpush3.bf16.msra.mxu1 %v6441_v50  ;;  %5612 = vmatprep.subr.bf16.mxu0 %v6445_v42  ;;  %p6470_p0 = scmp.ne.s32.totalorder %s4930_s18, %s6469_s19  ;;  %p6475_p2 = scmp.lt.s32.totalorder %s6469_s19, %s6469_s19 }
 0x231   :  { %5626 = vmatprep.subr.bf16.mxu1 %v6444_v2 }
 0x232   :  { %p6476_p3 = por %p6475_p2, %p6474_p1 }
 0x233   :  { %4728 = vmatmul.mubr.bf16.vlgmr.msra.gmra.mxu1 %v7926_v13  ;;  %5613 = vmatpush3.bf16.msra.mxu0 %v6447_v52  ;;  %v6453_v13 = vld [vmem:[%s8484_s4 + $0x6e0] ss:$12 sps:$4 sm:$0xff]   ;;  %v2766_v52 = vrot.slane %v8464_v48, %v7351_v25 }
 0x234   :  { %5627 = vmatpush3.bf16.msra.mxu1 %v6446_v59  ;;  %4809 = vmatprep.mubr.bf16.mxu1 %v8161_v41  ;;  %v6454_v41 = vld [vmem:[%s8484_s4 + $0x800] ss:$12 sps:$4 sm:$0xff]   ;;  %p6477_p4 = pnand %p6476_p3, %p6470_p0 }
 0x235   :  { %5628 = vmatprep.subr.bf16.mxu1 %v6448_v34  ;;  %5614 = vmatprep.subr.bf16.mxu0 %v6449_v53  ;;  %v4397_v34 = vpop.f32.mrf.mxu1 }
 0x237   :  { %5615 = vmatpush3.bf16.msra.mxu0 %v6451_v43 }
 0x238   :  { %5629 = vmatpush3.bf16.msra.mxu1 %v6450_v16  ;;  %5616 = vmatprep.subr.bf16.mxu0 %v6453_v13 }
 0x239   :  { %5630 = vmatprep.subr.bf16.mxu1 %v6452_v57  ;;  %v2770_v57 = vrot.slane %v8464_v48, %v7426_v63 }
 0x23b   :  { %5617 = vmatpush3.bf16.msra.mxu0 %v6455_v60  ;;  %v4355_v7 = vadd.f32 %v4354_v32, %v2770_v57 }
 0x23c   :  { %5631 = vmatpush3.bf16.msra.mxu1 %v6454_v41  ;;  %5618 = vmatprep.subr.bf16.mxu0 %v6457_v8 }
 0x23d   :  { %5632 = vmatprep.subr.bf16.mxu1 %v6456_v55  ;;  %v4349_v55 = vadd.f32 %v4348_v10, %v2766_v52 }
 0x23f   :  { %5619 = vmatpush3.bf16.msra.mxu0 %v6459_v14  ;;  %v4392_v25 = vadd.f32 %v4391_v28, %v4349_v55 }
 0x240   :  { %5633 = vmatpush3.bf16.msra.mxu1 %v6458_v61 }
 0x241   :  { %5634 = vmatprep.subr.bf16.mxu1 %v6460_v0  ;;  %v4351_v0 = vadd.f32 %v4350_v18, %v2770_v57  ;;  %v4398_v18 = vadd.f32 %v4397_v34, %v4355_v7 }
 0x242   :  { %4769 = vmatmul.mubr.bf16.vlgmr.msra.gmra.mxu0 %v8131_v35  ;;  %v6466_v35 = vld [vmem:[%s8484_s4 + $0x848] ss:$12 sps:$4 sm:$0xff]  }
 0x243   :  { %v4394_v26 = vadd.f32 %v4393_v40, %v4351_v0 }
 0x244   :  { %5635 = vmatpush3.bf16.msra.mxu1 %v6461_v1 }
 0x245   :  { %5636 = vmatprep.subr.bf16.mxu1 %v6462_v58 }
 0x248   :  { %5637 = vmatpush3.bf16.msra.mxu1 %v6463_v4 }
 0x249   :  { %5638 = vmatprep.subr.bf16.mxu1 %v6464_v12 }
 0x24c   :  { %5639 = vmatpush3.bf16.msra.mxu1 %v6465_v5  ;;  %v4353_v5 = vadd.f32 %v4352_v22, %v2766_v52 }
 0x24d   :  { %5640 = vmatprep.subr.bf16.mxu1 %v6466_v35 }
 0x24e   :  { %v4396_v10 = vadd.f32 %v4395_v49, %v4353_v5 }
 0x250   :  { %5641 = vmatpush3.bf16.msra.mxu1 %v6467_v6 }
 0x253   :  { %4810 = vmatmul.mubr.bf16.vlgmr.msra.gmra.mxu1 %v8169_v45  ;;  %v8451_v45 = vstv %s4838_s17 }
 0x254   :  { %v4840_v11 = vxor.u32 %v8451_v45, %v4831_v56  ;;  %v4841_v30 = vxor.u32 %v8451_v45, %v4832_v15  ;;  %v4843_v46 = vxor.u32 %v8451_v45, %v4834_v20  ;;  %v4844_v21 = vxor.u32 %v8451_v45, %v4835_v17 }
 0x256   :  { %v4846_v3 = vshrl.u32 %v4840_v11, 16  ;;  %v4847_v19 = vshrl.u32 %v4841_v30, 16  ;;  %v4849_v27 = vshrl.u32 %v4843_v46, 16  ;;  %v4850_v31 = vshrl.u32 %v4844_v21, 16 }
 0x258   :  { %v4852_v23 = vxor.u32 %v4846_v3, %v4840_v11  ;;  %v4853_v29 = vxor.u32 %v4847_v19, %v4841_v30  ;;  %v4855_v39 = vxor.u32 %v4849_v27, %v4843_v46  ;;  %v4856_v24 = vxor.u32 %v4850_v31, %v4844_v21 }
 0x25a   :  { %v4858_v36 = vmul.u32 2146121005, %v4852_v23  ;;  %v4859_v44 = vmul.u32 2146121005, %v4853_v29 }
 0x25b   :  { %v4861_v33 = vmul.u32 2146121005, %v4855_v39  ;;  %v4862_v2 = vmul.u32 2146121005, %v4856_v24 }
 0x25c   :  { %v4864_v47 = vshrl.u32 %v4858_v36, 15  ;;  %v4865_v51 = vshrl.u32 %v4859_v44, 15 }
 0x25d   :  { %v4867_v59 = vshrl.u32 %v4861_v33, 15  ;;  %v4868_v43 = vshrl.u32 %v4862_v2, 15 }
 0x25e   :  { %v4870_v42 = vxor.u32 %v4864_v47, %v4858_v36  ;;  %v4871_v16 = vxor.u32 %v4865_v51, %v4859_v44 }
 0x25f   :  { %v4873_v60 = vxor.u32 %v4867_v59, %v4861_v33  ;;  %v4874_v14 = vxor.u32 %v4868_v43, %v4862_v2 }
 0x260   :  { %v4876_v41 = vmul.u32 2221713035, %v4870_v42  ;;  %v4877_v61 = vmul.u32 2221713035, %v4871_v16 }
 0x261   :  { %v4879_v12 = vmul.u32 2221713035, %v4873_v60  ;;  %v4880_v6 = vmul.u32 2221713035, %v4874_v14 }
 0x262   :  { %v4434_v37 = vpop.f32.mrf.mxu0  ;;  %v4882_v4 = vshrl.u32 %v4876_v41, 16  ;;  %v4883_v35 = vshrl.u32 %v4877_v61, 16 }
 0x263   :  { %v4477_v13 = vpop.f32.mrf.mxu1  ;;  %v4435_v56 = vadd.f32 %v4434_v37, %v4392_v25  ;;  %v4885_v20 = vshrl.u32 %v4879_v12, 16  ;;  %v4886_v3 = vshrl.u32 %v4880_v6, 16 }
 0x264   :  { %v4436_v50 = vpop.f32.mrf.mxu0  ;;  %v4888_v11 = vxor.u32 %v4882_v4, %v4876_v41  ;;  %v4889_v17 = vxor.u32 %v4883_v35, %v4877_v61  ;;  %v4824_v61 = vadd.s32 256, %v8437_v62 }
 0x265   :  { %v4479_v1 = vpop.f32.mrf.mxu1  ;;  %v4437_v30 = vadd.f32 %v4436_v50, %v4394_v26  ;;  %v4478_v46 = vadd.f32 %v4477_v13, %v4435_v56  ;;  %v4891_v22 = vxor.u32 %v4885_v20, %v4879_v12  ;;  %v4892_v39 = vxor.u32 %v4886_v3, %v4880_v6 }
 0x266   :  { %v4438_v53 = vpop.f32.mrf.mxu0  ;;  %v4894_v27 = vshrl.u32 %v4888_v11, 31  ;;  %v4895_v36 = vshrl.u32 %v4889_v17, 31  ;;  %v4833_v0 = vadd.s32 %v8440_v54, %v4824_v61  ;;  %v4836_v4 = vadd.s32 %v8449_v9, %v4824_v61 }
 0x267   :  { %v4481_v63 = vpop.f32.mrf.mxu1  ;;  %v4439_v19 = vadd.f32 %v4438_v53, %v4396_v10  ;;  %v4480_v28 = vadd.f32 %v4479_v1, %v4437_v30  ;;  %v4897_v33 = vshrl.u32 %v4891_v22, 31  ;;  %v4898_v59 = vshrl.u32 %v4892_v39, 31 }
 0x268   :  { %v4440_v8 = vpop.f32.mrf.mxu0  ;;  %vm4900_vm0 = vcmp.eq.s32.totalorder %v4894_v27, 0  ;;  %vm4901_vm1 = vcmp.eq.s32.totalorder %v4895_v36, 0  ;;  %v4845_v5 = vxor.u32 %v8451_v45, %v4836_v4  ;;  %v2774_v27 = vrot.slane %v8464_v48, %v7628_v38 }
 0x269   :  { %v4483_v21 = vpop.f32.mrf.mxu1  ;;  %v4441_v29 = vadd.f32 %v4440_v8, %v4398_v18  ;;  %v4482_v40 = vadd.f32 %v4481_v63, %v4439_v19  ;;  %vm4903_vm2 = vcmp.eq.s32.totalorder %v4897_v33, 0  ;;  %vm4904_vm3 = vcmp.eq.s32.totalorder %v4898_v59, 0 }
 0x26a   :  { %v4851_v56 = vshrl.u32 %v4845_v5, 16 }
 0x26b   :  { %v4484_v49 = vadd.f32 %v4483_v21, %v4441_v29 }
 0x26c   :  { %v4857_v11 = vxor.u32 %v4851_v56, %v4845_v5 }
 0x26e   :  { %v4863_v30 = vmul.u32 2146121005, %v4857_v11 }
 0x2a2   :  { %v4520_v58 = vpop.f32.mrf.mxu0 }
 0x2a3   :  { %v4521_v31 = vadd.f32 %v4520_v58, %v4478_v46  ;;  %v4842_v58 = vxor.u32 %v8451_v45, %v4833_v0  ;;  %v4869_v46 = vshrl.u32 %v4863_v30, 15 }
 0x2a4   :  { %v4522_v15 = vpop.f32.mrf.mxu0 }
 0x2a5   :  { %v4523_v37 = vadd.f32 %v4522_v15, %v4480_v28  ;;  %v4848_v25 = vshrl.u32 %v4842_v58, 16 }
 0x2a6   :  { %v4524_v23 = vpop.f32.mrf.mxu0 }
 0x2a7   :  { %v4525_v50 = vadd.f32 %v4524_v23, %v4482_v40  ;;  %v4854_v7 = vxor.u32 %v4848_v25, %v4842_v58  ;;  %v4875_v23 = vxor.u32 %v4869_v46, %v4863_v30 }
 0x2a8   :  { %v4526_v24 = vpop.f32.mrf.mxu0 }
 0x2a9   :  { %v4527_v52 = vadd.f32 %v4526_v24, %v4484_v49  ;;  %v4860_v62 = vmul.u32 2146121005, %v4854_v7  ;;  %v4881_v36 = vmul.u32 2221713035, %v4875_v23 }
 0x2ab   :  { %v4866_v10 = vshrl.u32 %v4860_v62, 15 }
 0x2ad   :  { %v4872_v18 = vxor.u32 %v4866_v10, %v4860_v62 }
 0x2af   :  { %v4878_v21 = vmul.u32 2221713035, %v4872_v18 }
 0x2b3   :  { %v4563_v32 = vpop.f32.mrf.mxu1 }
 0x2b4   :  { %v4564_v44 = vadd.f32 %v4563_v32, %v4521_v31  ;;  %v4884_v32 = vshrl.u32 %v4878_v21, 16 }
 0x2b5   :  { %v4565_v47 = vpop.f32.mrf.mxu1 }
 0x2b6   :  { %v4906_v51 = vmul.f32 2.0, %v4564_v44  ;;  %v4566_v2 = vadd.f32 %v4565_v47, %v4523_v37 }
 0x2b7   :  { %v4567_v42 = vpop.f32.mrf.mxu1 }
 0x2b8   :  { %v4912_v34 = vsel %vm4900_vm0, %v4906_v51, 0.0  ;;  %v4907_v53 = vmul.f32 2.0, %v4566_v2  ;;  %v4568_v16 = vadd.f32 %v4567_v42, %v4525_v50  ;;  %v4890_v50 = vxor.u32 %v4884_v32, %v4878_v21 }
 0x2b9   :  { %4918 = vst [vmem:[#allocation4] sm:$0xff] %v4912_v34  ;;  %v4569_v43 = vpop.f32.mrf.mxu1  ;;  %v4887_v51 = vshrl.u32 %v4881_v36, 16 }
 0x2ba   :  { %v4913_v57 = vsel %vm4901_vm1, %v4907_v53, 0.0  ;;  %v4909_v13 = vmul.f32 2.0, %v4568_v16  ;;  %v4570_v41 = vadd.f32 %v4569_v43, %v4527_v52 }
 0x2bb   :  { %4919 = vst [vmem:[#allocation4 + $0x8] sm:$0xff] %v4913_v57  ;;  %v4896_v57 = vshrl.u32 %v4890_v50, 31 }
 0x2bc   :  { %v4915_v60 = vsel %vm4903_vm2, %v4909_v13, 0.0  ;;  %v4910_v55 = vmul.f32 2.0, %v4570_v41  ;;  %v4893_v13 = vxor.u32 %v4887_v51, %v4881_v36 }
 0x2bd   :  { %4921 = vst [vmem:[#allocation4 + $0x18] sm:$0xff] %v4915_v60  ;;  %vm4902_vm4 = vcmp.eq.s32.totalorder %v4896_v57, 0 }
 0x2be   :  { %v4916_v8 = vsel %vm4904_vm3, %v4910_v55, 0.0  ;;  %v4899_v58 = vshrl.u32 %v4893_v13, 31 }
 0x2bf   :  { %4922 = vst [vmem:[#allocation4 + $0x20] sm:$0xff] %v4916_v8 }
 0x2c0   :  { %vm4905_vm5 = vcmp.eq.s32.totalorder %v4899_v58, 0 }
 0x2c2   :  { %v5532_v14 = vpop.f32.mrf.mxu0 }
 0x2c4   :  { %v5533_v1 = vpop.f32.mrf.mxu0 }
 0x2c5   :  { %v5534_v22 = vadd.f32 %v5533_v1, %v5532_v14 }
 0x2c6   :  { %v5535_v12 = vpop.f32.mrf.mxu0 }
 0x2c7   :  { %v4607_v39 = vadd.f32 %v5534_v22, %v2774_v27 }
 0x2c8   :  { %v5536_v35 = vpop.f32.mrf.mxu0 }
 0x2c9   :  { %v5537_v40 = vadd.f32 %v5536_v35, %v5535_v12 }
 0x2cb   :  { %v4610_v2 = vadd.f32 %v5537_v40, %v2774_v27 }
 0x2d3   :  { %v5554_v6 = vpop.f32.mrf.mxu1 }
 0x2d5   :  { %v5555_v63 = vpop.f32.mrf.mxu1 }
 0x2d6   :  { %v5556_v29 = vadd.f32 %v5555_v63, %v5554_v6 }
 0x2d7   :  { %v5557_v20 = vpop.f32.mrf.mxu1 }
 0x2d8   :  { %v4648_v24 = vadd.f32 %v5556_v29, %v4607_v39 }
 0x2d9   :  { %v5558_v17 = vpop.f32.mrf.mxu1 }
 0x2da   :  { %v5559_v47 = vadd.f32 %v5558_v17, %v5557_v20 }
 0x2dc   :  { %v4651_v34 = vadd.f32 %v5559_v47, %v4610_v2 }
 0x2e2   :  { %v5576_v26 = vpop.f32.mrf.mxu0 }
 0x2e4   :  { %v5577_v15 = vpop.f32.mrf.mxu0 }
 0x2e5   :  { %v5578_v37 = vadd.f32 %v5577_v15, %v5576_v26 }
 0x2e6   :  { %v5579_v54 = vpop.f32.mrf.mxu0 }
 0x2e7   :  { %v4689_v42 = vadd.f32 %v5578_v37, %v4648_v24 }
 0x2e8   :  { %v5580_v3 = vpop.f32.mrf.mxu0 }
 0x2e9   :  { %v5581_v59 = vadd.f32 %v5580_v3, %v5579_v54 }
 0x2eb   :  { %v4692_v41 = vadd.f32 %v5581_v59, %v4651_v34 }
 0x2f3   :  { %v5598_v9 = vpop.f32.mrf.mxu1 }
 0x2f5   :  { %v5599_v45 = vpop.f32.mrf.mxu1 }
 0x2f6   :  { %v5600_v33 = vadd.f32 %v5599_v45, %v5598_v9 }
 0x2f7   :  { %v5601_v31 = vpop.f32.mrf.mxu1 }
 0x2f8   :  { %v4730_v53 = vadd.f32 %v5600_v33, %v4689_v42 }
 0x2f9   :  { %v5602_v49 = vpop.f32.mrf.mxu1 }
 0x2fa   :  { %v5603_v16 = vadd.f32 %v5602_v49, %v5601_v31 }
 0x2fc   :  { %v4733_v14 = vadd.f32 %v5603_v16, %v4692_v41 }
 0x302   :  { %v5620_v19 = vpop.f32.mrf.mxu0 }
 0x304   :  { %v5621_v28 = vpop.f32.mrf.mxu0 }
 0x305   :  { %v5622_v38 = vadd.f32 %v5621_v28, %v5620_v19 }
 0x306   :  { %v5623_v44 = vpop.f32.mrf.mxu0 }
 0x307   :  { %v4771_v60 = vadd.f32 %v5622_v38, %v4730_v53 }
 0x308   :  { %v5624_v48 = vpop.f32.mrf.mxu0 }
 0x309   :  { %v5625_v55 = vadd.f32 %v5624_v48, %v5623_v44 }
 0x30b   :  { %v4774_v4 = vadd.f32 %v5625_v55, %v4733_v14 }
 0x313   :  { %v5642_v52 = vpop.f32.mrf.mxu1 }
 0x315   :  { %v5643_v43 = vpop.f32.mrf.mxu1 }
 0x316   :  { %v5644_v8 = vadd.f32 %v5643_v43, %v5642_v52 }
 0x317   :  { %v5645_v61 = vpop.f32.mrf.mxu1 }
 0x318   :  { %v4812_v0 = vadd.f32 %v5644_v8, %v4771_v60 }
 0x319   :  { %v5646_v1 = vpop.f32.mrf.mxu1 }
 0x31a   :  { %v4908_v12 = vmul.f32 2.0, %v4812_v0  ;;  %v5647_v25 = vadd.f32 %v5646_v1, %v5645_v61 }
 0x31c   :  { %v4914_v5 = vsel %vm4902_vm4, %v4908_v12, 0.0  ;;  %v4815_v35 = vadd.f32 %v5647_v25, %v4774_v4 }
 0x31d   :  { %4920 = vst [vmem:[#allocation4 + $0x10] sm:$0xff] %v4914_v5 }
 0x31e   :  { %v4911_v6 = vmul.f32 2.0, %v4815_v35 }
 0x320   :  { %v4917_v26 = vsel %vm4905_vm5, %v4911_v6, 0.0 }
 0x321   :  { %4923 = vst [vmem:[#allocation4 + $0x28] sm:$0xff] %v4917_v26 }
 0x322   :  { %6480 = shalt.err (!%p6477_p4)
}
 0x323   :  { %s6493_s20 = smov 384   ;;  %s6494_s21 = smov 24  }
 0x324   :  { %4935 = dma.vmem_to_hbm [thread:$0]  %s4930_s18, 768, %s8486_s6, [#allocation5], %s6493_s20, %s6493_s20, %s6494_s21  }
 0x325   :  { %6489 = dma.done.wait [#allocation5], 768  }
 0x326   :  { %6490 = vsyncadd [#allocation5], 4294966528 }
 0x327   :  { %4939 = vsyncpa [#allocation5], 1 }

</bundles_post_ra>
